<compile_context>
chip_gen: v5e
topology: v5e:2x2
jax: 0.10.0
libtpu: 0.0.40
codegen_flags: <defaults>
</compile_context>

<pallas_src>
import functools

import numpy as np
import jax
import jax.numpy as jnp
from jax.experimental import pallas as pl
from jax.experimental.pallas import tpu as pltpu


# ----------------------------- Pallas kernel ------------------------------ #
def property_tdm_kernel(cart_ref, spec_proj_ref, mu_ref, eta_ref,
                        w1_ref, b1_ref, w2_ref, b2_ref,
                        tdm_ref, radial_acc, *, nblk):
    """grid = (molecule_block, neighbor_block); BM molecules per outer step."""
    nb = pl.program_id(1)
    bm, natoms, _ = cart_ref.shape
    nfeat = mu_ref.shape[1]

    # ---- init per-atom radial-density accumulator at the first neighbor block
    @pl.when(nb == 0)
    def _init():
        radial_acc[...] = jnp.zeros_like(radial_acc)

    cart = cart_ref[...]                                        # (BM, A, 3) raw
    # Center per molecule: distances are translation invariant; centering keeps
    # the Gram identity well conditioned for coordinates far from the origin.
    centroid = jnp.mean(cart, axis=1, keepdims=True)            # (BM, 1, 3)
    cart_c = cart - centroid

    start = pl.multiple_of(nb * nblk, nblk)
    nbr_c = cart_ref[:, pl.ds(start, nblk), :] - centroid       # (BM, NBLK, 3)

    # ---- pairwise distances as ONE batched MXU matmul (augmented Gram) -----
    #   |xi - xj|^2 = [xi, |xi|^2, 1] . [-2 xj, 1, |xj|^2]
    sq_i = jnp.sum(cart_c * cart_c, axis=2, keepdims=True)      # (BM, A, 1)
    sq_j = jnp.sum(nbr_c * nbr_c, axis=2, keepdims=True)        # (BM, NBLK, 1)
    ones_i = jnp.ones((bm, natoms, 1), jnp.float32)
    ones_j = jnp.ones((bm, nblk, 1), jnp.float32)
    lhs = jnp.concatenate([cart_c, sq_i, ones_i], axis=2)       # (BM, A, 5)
    rhs = jnp.concatenate([-2.0 * nbr_c, ones_j, sq_j], axis=2) # (BM, NBLK, 5)
    r2 = jnp.einsum('mai,mni->man', lhs, rhs,
                    preferred_element_type=jnp.float32)         # (BM, A, NBLK)
    r = jnp.sqrt(jnp.maximum(r2, 0.0))                          # lane-dense

    # ---- Gaussian radial features: lane-dense per-feature tiles ------------
    ones_nbr = jnp.ones((bm, 1, nblk), jnp.float32)             # hoisted
    cols = []
    for f in range(nfeat):                       # static loop, F is small (16)
        mu_f = mu_ref[0, f]                      # scalar read from SMEM
        eta_f = eta_ref[0, f]
        d = r - mu_f
        g = jnp.exp(-eta_f * d * d)              # (BM, A, NBLK), fully packed
        # neighbor reduction on the (otherwise idle) MXU: sum_n g[m,a,n]
        cols.append(jnp.einsum('man,mkn->mak', g, ones_nbr,
                               preferred_element_type=jnp.float32))  # (BM, A, 1)
    radial_acc[...] += jnp.concatenate(cols, axis=2)            # one dense accumulate

    # ---- last neighbor block: MLP + TDM reductions --------------------------
    @pl.when(nb == pl.num_programs(1) - 1)
    def _finalize():
        density = radial_acc[...] * spec_proj_ref[...]          # (BM, A, F)

        w1b = jnp.broadcast_to(w1_ref[...], (bm,) + tuple(w1_ref.shape))
        h = jnp.tanh(jnp.einsum('maf,mfh->mah', density, w1b,
                                preferred_element_type=jnp.float32)
                     + b1_ref[...])                             # (BM, A, H)
        w2b = jnp.broadcast_to(w2_ref[...], (bm,) + tuple(w2_ref.shape))
        out = (jnp.einsum('mah,mho->mao', h, w2b,
                          preferred_element_type=jnp.float32)
               + b2_ref[...])                                   # (BM, A, 3)

        # varene = sum_a out[:, a, 2]
        # dipole_n[k] = sum_a out[:, a, n] * cart[:, a, k]  (raw, uncentered cart)
        varene = jnp.sum(out[:, :, 2:3], axis=1)                # (BM, 1)
        d0 = jnp.sum(out[:, :, 0:1] * cart, axis=1)             # (BM, 3)
        d1 = jnp.sum(out[:, :, 1:2] * cart, axis=1)             # (BM, 3)

        # cross(dipole0, dipole1) per molecule
        cx = d0[:, 1:2] * d1[:, 2:3] - d0[:, 2:3] * d1[:, 1:2]
        cy = d0[:, 2:3] * d1[:, 0:1] - d0[:, 0:1] * d1[:, 2:3]
        cz = d0[:, 0:1] * d1[:, 1:2] - d0[:, 1:2] * d1[:, 0:1]
        cross = jnp.concatenate([cx, cy, cz], axis=1)           # (BM, 3)

        tdm_ref[...] = d0 + d1 + varene * cross                 # (BM, 3)


# ------------------------------- wrapper ----------------------------------- #
def property_forward(params, cart, numatoms, species, atom_index, shifts):
    """Mirrors Property.forward(cart, numatoms, species, atom_index, shifts)."""
    del atom_index, shifts  # TODO(synk): synthetic density uses dense all-pairs
    #                         distances instead of the neighbor-list / PBC shifts.
    # TODO(synk): numatoms is not used to mask padded atoms (matches reference).
    B = numatoms.shape[0]
    A = cart.shape[1]
    F = params['mu'].shape[1]
    H = params['W1'].shape[1]

    # Species projection precomputed outside the kernel: (NSPEC,E)@(E,F) + gather.
    spec_table = jnp.dot(params['emb'], params['We'])                 # (NSPEC, F)
    spec_proj = spec_table[species.reshape(-1)].reshape(B, A, F).astype(jnp.float32)
    cart_f32 = cart.astype(jnp.float32)

    # Neighbor-axis tiling: full if small, 128-atom lane blocks otherwise.
    NBLK = A if A <= 128 else 128
    assert A % NBLK == 0, "atom count must be a multiple of the neighbor block"
    NB = A // NBLK

    # Molecule blocking: amortize per-grid-step overhead for small molecules.
    BM = B if B <= 16 else 16
    Bp = ((B + BM - 1) // BM) * BM
    if Bp != B:
        pad = Bp - B
        cart_f32 = jnp.pad(cart_f32, ((0, pad), (0, 0), (0, 0)))
        spec_proj = jnp.pad(spec_proj, ((0, pad), (0, 0), (0, 0)))

    grid_spec = pltpu.PrefetchScalarGridSpec(
        num_scalar_prefetch=0,
        grid=(Bp // BM, NB),
        in_specs=[
            pl.BlockSpec((BM, A, 3), lambda b, n: (b, 0, 0)),       # cart
            pl.BlockSpec((BM, A, F), lambda b, n: (b, 0, 0)),       # species proj
            pl.BlockSpec(memory_space=pltpu.MemorySpace.SMEM),      # mu  (1, F)
            pl.BlockSpec(memory_space=pltpu.MemorySpace.SMEM),      # eta (1, F)
            pl.BlockSpec((F, H), lambda b, n: (0, 0)),              # W1
            pl.BlockSpec((1, H), lambda b, n: (0, 0)),              # b1
            pl.BlockSpec((H, 3), lambda b, n: (0, 0)),              # W2
            pl.BlockSpec((1, 3), lambda b, n: (0, 0)),              # b2
        ],
        out_specs=pl.BlockSpec((BM, 3), lambda b, n: (b, 0)),
        scratch_shapes=[pltpu.VMEM((BM, A, F), jnp.float32)],
    )

    tdm = pl.pallas_call(
        functools.partial(property_tdm_kernel, nblk=NBLK),
        out_shape=jax.ShapeDtypeStruct((Bp, 3), jnp.float32),
        grid_spec=grid_spec,
        compiler_params=pltpu.CompilerParams(
            # TODO(synk): for very large A on v7x, add a query-atom "parallel"
            # grid axis so both TensorCores stay busy even when B is small.
            dimension_semantics=("parallel", "arbitrary"),
            vmem_limit_bytes=32 * 1024 * 1024),
    )(cart_f32, spec_proj, params['mu'], params['eta'],
      params['W1'], params['b1'], params['W2'], params['b2'])

    return (tdm[:B],)


# --------------------------- plain-JAX reference --------------------------- #
def property_reference(params, cart, numatoms, species, atom_index, shifts):
    del atom_index, shifts
    B = numatoms.shape[0]
    species_flat = species.reshape(-1)
    E = params['emb'].shape[1]
    spec_vec = params['emb'][species_flat].reshape(B, -1, E).astype(jnp.float32)

    diff3 = cart[:, :, None, :] - cart[:, None, :, :]
    r = jnp.sqrt(jnp.maximum(jnp.sum(diff3 * diff3, axis=-1), 0.0))
    dmu = r[:, :, :, None] - params['mu'][0][None, None, None, :]
    radial = jnp.sum(jnp.exp(-params['eta'][0][None, None, None, :] * dmu * dmu), axis=2)
    density = radial * jnp.einsum('bae,ef->baf', spec_vec, params['We'])

    h = jnp.tanh(jnp.einsum('baf,fh->bah', density, params['W1']) + params['b1'][None])
    output = (jnp.einsum('bah,ho->bao', h, params['W2']) + params['b2'][None])
    output = output.reshape(B, -1, 3)

    varene = jnp.sum(output[:, :, 2], axis=1)
    dipole = jnp.einsum('ijn,ijk->nik', output[:, :, 0:2], cart)
    tdm = dipole[0] + dipole[1] + varene[:, None] * jnp.cross(dipole[0], dipole[1], axis=1)
    return (tdm,)


# --------------------------------- main ------------------------------------ #
if __name__ == "__main__":
    B, A = 2, 8          # batch of molecules, atoms per molecule
    F, E, H = 16, 8, 32  # radial features, species embedding, hidden width
    NSPEC = 4

    key = jax.random.PRNGKey(0)
    k = jax.random.split(key, 8)

    params = {
        'emb': 0.5 * jax.random.normal(k[0], (NSPEC, E), dtype=jnp.float32),
        'mu':  jnp.linspace(0.5, 4.0, F, dtype=jnp.float32).reshape(1, F),
        'eta': jnp.full((1, F), 1.5, dtype=jnp.float32),
        'We':  jax.random.normal(k[1], (E, F), dtype=jnp.float32) / np.sqrt(E),
        'W1':  jax.random.normal(k[2], (F, H), dtype=jnp.float32) / np.sqrt(F),
        'b1':  0.1 * jax.random.normal(k[3], (1, H), dtype=jnp.float32),
        'W2':  jax.random.normal(k[4], (H, 3), dtype=jnp.float32) / np.sqrt(H),
        'b2':  0.1 * jax.random.normal(k[5], (1, 3), dtype=jnp.float32),
    }

    cart = 2.0 * jax.random.normal(k[6], (B, A, 3), dtype=jnp.float32)
    species = jax.random.randint(k[7], (B, A), 0, NSPEC, dtype=jnp.int32)
    numatoms = jnp.full((B,), A, dtype=jnp.int32)
    # dummy neighbor-list inputs (signature compatibility only)
    atom_index = jnp.zeros((2, B * A * (A - 1)), dtype=jnp.int32)
    shifts = jnp.zeros((B * A * (A - 1), 3), dtype=jnp.float32)

    (tdm,) = property_forward(params, cart, numatoms, species, atom_index, shifts)
    tdm = jax.block_until_ready(tdm)

    (tdm_ref,) = property_reference(params, cart, numatoms, species, atom_index, shifts)
    np.testing.assert_allclose(np.asarray(tdm), np.asarray(tdm_ref),
                               rtol=2e-3, atol=2e-3)
    print("KERNEL_OK")
</pallas_src>

<mosaic_0001>
module attributes {stable_mosaic.version = 11 : i64} {
  func.func @property_tdm_kernel(%arg0: i32, %arg1: i32, %arg2: memref<2x8x3xf32, #tpu.memory_space<vmem>>, %arg3: memref<2x8x16xf32, #tpu.memory_space<vmem>>, %arg4: memref<1x16xf32, #tpu.memory_space<smem>>, %arg5: memref<1x16xf32, #tpu.memory_space<smem>>, %arg6: memref<16x32xf32, #tpu.memory_space<vmem>>, %arg7: memref<1x32xf32, #tpu.memory_space<vmem>>, %arg8: memref<32x3xf32, #tpu.memory_space<vmem>>, %arg9: memref<1x3xf32, #tpu.memory_space<vmem>>, %arg10: memref<2x3xf32, #tpu.memory_space<vmem>>, %arg11: memref<2x8x16xf32, #tpu.memory_space<vmem>>) attributes {dimension_semantics = [#tpu.dimension_semantics<parallel>, #tpu.dimension_semantics<arbitrary>], iteration_bounds = array<i64: 1, 1>, scalar_prefetch = 0 : i64, scratch_operands = 1 : i64, tpu.core_type = #tpu.core_type<tc>, window_params = [{transform_indices = @transform_0, window_bounds = array<i64: 2, 8, 3>}, {transform_indices = @transform_1, window_bounds = array<i64: 2, 8, 16>}, {transform_indices = @transform_2, window_bounds = array<i64: 1, 16>}, {transform_indices = @transform_3, window_bounds = array<i64: 1, 16>}, {pipeline_mode = #tpu.pipeline_mode<synchronous>, transform_indices = @transform_4, window_bounds = array<i64: 16, 32>}, {pipeline_mode = #tpu.pipeline_mode<synchronous>, transform_indices = @transform_5, window_bounds = array<i64: 1, 32>}, {pipeline_mode = #tpu.pipeline_mode<synchronous>, transform_indices = @transform_6, window_bounds = array<i64: 32, 3>}, {pipeline_mode = #tpu.pipeline_mode<synchronous>, transform_indices = @transform_7, window_bounds = array<i64: 1, 3>}, {transform_indices = @transform_8, window_bounds = array<i64: 2, 3>}]} {
    %c0_i32 = arith.constant 0 : i32
    %0 = arith.cmpi eq, %arg1, %c0_i32 : i32
    %1 = arith.extui %0 : i1 to i32
    %c0_i32_0 = arith.constant 0 : i32
    %2 = arith.cmpi ne, %1, %c0_i32_0 : i32
    scf.if %2 {
      %cst_103 = arith.constant 0.000000e+00 : f32
      %200 = vector.broadcast %cst_103 : f32 to vector<2x8x16xf32>
      %c0_104 = arith.constant 0 : index
      %c0_105 = arith.constant 0 : index
      %c0_106 = arith.constant 0 : index
      %201 = vector.load %arg11[%c0_104, %c0_105, %c0_106] : memref<2x8x16xf32, #tpu.memory_space<vmem>>, vector<2x8x16xf32>
      tpu.vector_store %arg11[%c0_104, %c0_105, %c0_106], %200 {strides = array<i32>} : memref<2x8x16xf32, #tpu.memory_space<vmem>>, vector<2x8x16xf32>,
    } else {
    }
    %c0 = arith.constant 0 : index
    %c0_1 = arith.constant 0 : index
    %c0_2 = arith.constant 0 : index
    %3 = vector.load %arg2[%c0, %c0_1, %c0_2] : memref<2x8x3xf32, #tpu.memory_space<vmem>>, vector<2x8x3xf32>
    %cst = arith.constant dense<0.000000e+00> : vector<2x3xf32>
    %4 = vector.multi_reduction <add>, %3, %cst [1] : vector<2x8x3xf32> to vector<2x3xf32>
    %5 = vector.shape_cast %4 : vector<2x3xf32> to vector<2x1x3xf32>
    %cst_3 = arith.constant 8.000000e+00 : f32
    %6 = vector.broadcast %cst_3 : f32 to vector<2x1x3xf32>
    %7 = arith.divf %5, %6 : vector<2x1x3xf32>
    %8 = vector.broadcast %7 : vector<2x1x3xf32> to vector<2x8x3xf32>
    %9 = arith.subf %3, %8 : vector<2x8x3xf32>
    %c8_i32 = arith.constant 8 : i32
    %10 = arith.muli %arg1, %c8_i32 : i32
    %11 = tpu.assume_multiple %10, 8 : i32
    %c0_4 = arith.constant 0 : index
    %12 = arith.index_cast %11 : i32 to index
    %c0_5 = arith.constant 0 : index
    %13 = vector.load %arg2[%c0_4, %12, %c0_5] : memref<2x8x3xf32, #tpu.memory_space<vmem>>, vector<2x8x3xf32>
    %14 = vector.broadcast %7 : vector<2x1x3xf32> to vector<2x8x3xf32>
    %15 = arith.subf %13, %14 : vector<2x8x3xf32>
    %16 = arith.mulf %9, %9 : vector<2x8x3xf32>
    %cst_6 = arith.constant dense<0.000000e+00> : vector<2x8xf32>
    %17 = vector.multi_reduction <add>, %16, %cst_6 [2] : vector<2x8x3xf32> to vector<2x8xf32>
    %18 = vector.shape_cast %17 : vector<2x8xf32> to vector<2x8x1xf32>
    %19 = arith.mulf %15, %15 : vector<2x8x3xf32>
    %cst_7 = arith.constant dense<0.000000e+00> : vector<2x8xf32>
    %20 = vector.multi_reduction <add>, %19, %cst_7 [2] : vector<2x8x3xf32> to vector<2x8xf32>
    %21 = vector.shape_cast %20 : vector<2x8xf32> to vector<2x8x1xf32>
    %cst_8 = arith.constant 1.000000e+00 : f32
    %22 = vector.broadcast %cst_8 : f32 to vector<2x8x1xf32>
    %cst_9 = arith.constant 1.000000e+00 : f32
    %23 = vector.broadcast %cst_9 : f32 to vector<2x8x1xf32>
    %24 = tpu.concatenate %9, %18, %22 in 2 : vector<2x8x3xf32>, vector<2x8x1xf32>, vector<2x8x1xf32> -> vector<2x8x5xf32>
    %cst_10 = arith.constant -2.000000e+00 : f32
    %25 = vector.broadcast %cst_10 : f32 to vector<2x8x3xf32>
    %26 = arith.mulf %25, %15 : vector<2x8x3xf32>
    %27 = tpu.concatenate %26, %23, %21 in 2 : vector<2x8x3xf32>, vector<2x8x1xf32>, vector<2x8x1xf32> -> vector<2x8x5xf32>
    "tpu.trace_start"() <{level = 10 : i32, message = "mai,mni->man"}> : () -> ()
    %cst_11 = arith.constant dense<0.000000e+00> : vector<2x8x8xf32>
    %28 = tpu.matmul %24, %27, %cst_11 {dimension_numbers = #tpu.dot_dimension_numbers<[2], [2], [1], [1], [0, 0, 0, 1, 1, 1], [0], [0]>} : vector<2x8x5xf32>, vector<2x8x5xf32>, vector<2x8x8xf32> -> vector<2x8x8xf32>
    "tpu.trace_stop"() : () -> ()
    %cst_12 = arith.constant 0.000000e+00 : f32
    %29 = vector.broadcast %cst_12 : f32 to vector<2x8x8xf32>
    %30 = arith.maximumf %28, %29 : vector<2x8x8xf32>
    %31 = math.sqrt %30 : vector<2x8x8xf32>
    %cst_13 = arith.constant 1.000000e+00 : f32
    %32 = vector.broadcast %cst_13 : f32 to vector<2x1x8xf32>
    %c0_14 = arith.constant 0 : index
    %c0_15 = arith.constant 0 : index
    %33 = memref.load %arg4[%c0_14, %c0_15] : memref<1x16xf32, #tpu.memory_space<smem>>
    %c0_16 = arith.constant 0 : index
    %c0_17 = arith.constant 0 : index
    %34 = memref.load %arg5[%c0_16, %c0_17] : memref<1x16xf32, #tpu.memory_space<smem>>
    %35 = vector.broadcast %33 : f32 to vector<2x8x8xf32>
    %36 = arith.subf %31, %35 : vector<2x8x8xf32>
    %cst_18 = arith.constant 0.000000e+00 : f32
    %37 = arith.subf %cst_18, %34 : f32
    %38 = vector.broadcast %37 : f32 to vector<2x8x8xf32>
    %39 = arith.mulf %38, %36 : vector<2x8x8xf32>
    %40 = arith.mulf %39, %36 : vector<2x8x8xf32>
    %41 = math.exp %40 : vector<2x8x8xf32>
    "tpu.trace_start"() <{level = 10 : i32, message = "man,mkn->mak"}> : () -> ()
    %cst_19 = arith.constant dense<0.000000e+00> : vector<2x8x1xf32>
    %42 = tpu.matmul %41, %32, %cst_19 {dimension_numbers = #tpu.dot_dimension_numbers<[2], [2], [1], [1], [0, 0, 0, 1, 1, 1], [0], [0]>} : vector<2x8x8xf32>, vector<2x1x8xf32>, vector<2x8x1xf32> -> vector<2x8x1xf32>
    "tpu.trace_stop"() : () -> ()
    %c0_20 = arith.constant 0 : index
    %c1 = arith.constant 1 : index
    %43 = memref.load %arg4[%c0_20, %c1] : memref<1x16xf32, #tpu.memory_space<smem>>
    %c0_21 = arith.constant 0 : index
    %c1_22 = arith.constant 1 : index
    %44 = memref.load %arg5[%c0_21, %c1_22] : memref<1x16xf32, #tpu.memory_space<smem>>
    %45 = vector.broadcast %43 : f32 to vector<2x8x8xf32>
    %46 = arith.subf %31, %45 : vector<2x8x8xf32>
    %cst_23 = arith.constant 0.000000e+00 : f32
    %47 = arith.subf %cst_23, %44 : f32
    %48 = vector.broadcast %47 : f32 to vector<2x8x8xf32>
    %49 = arith.mulf %48, %46 : vector<2x8x8xf32>
    %50 = arith.mulf %49, %46 : vector<2x8x8xf32>
    %51 = math.exp %50 : vector<2x8x8xf32>
    "tpu.trace_start"() <{level = 10 : i32, message = "man,mkn->mak"}> : () -> ()
    %cst_24 = arith.constant dense<0.000000e+00> : vector<2x8x1xf32>
    %52 = tpu.matmul %51, %32, %cst_24 {dimension_numbers = #tpu.dot_dimension_numbers<[2], [2], [1], [1], [0, 0, 0, 1, 1, 1], [0], [0]>} : vector<2x8x8xf32>, vector<2x1x8xf32>, vector<2x8x1xf32> -> vector<2x8x1xf32>
    "tpu.trace_stop"() : () -> ()
    %c0_25 = arith.constant 0 : index
    %c2 = arith.constant 2 : index
    %53 = memref.load %arg4[%c0_25, %c2] : memref<1x16xf32, #tpu.memory_space<smem>>
    %c0_26 = arith.constant 0 : index
    %c2_27 = arith.constant 2 : index
    %54 = memref.load %arg5[%c0_26, %c2_27] : memref<1x16xf32, #tpu.memory_space<smem>>
    %55 = vector.broadcast %53 : f32 to vector<2x8x8xf32>
    %56 = arith.subf %31, %55 : vector<2x8x8xf32>
    %cst_28 = arith.constant 0.000000e+00 : f32
    %57 = arith.subf %cst_28, %54 : f32
    %58 = vector.broadcast %57 : f32 to vector<2x8x8xf32>
    %59 = arith.mulf %58, %56 : vector<2x8x8xf32>
    %60 = arith.mulf %59, %56 : vector<2x8x8xf32>
    %61 = math.exp %60 : vector<2x8x8xf32>
    "tpu.trace_start"() <{level = 10 : i32, message = "man,mkn->mak"}> : () -> ()
    %cst_29 = arith.constant dense<0.000000e+00> : vector<2x8x1xf32>
    %62 = tpu.matmul %61, %32, %cst_29 {dimension_numbers = #tpu.dot_dimension_numbers<[2], [2], [1], [1], [0, 0, 0, 1, 1, 1], [0], [0]>} : vector<2x8x8xf32>, vector<2x1x8xf32>, vector<2x8x1xf32> -> vector<2x8x1xf32>
    "tpu.trace_stop"() : () -> ()
    %c0_30 = arith.constant 0 : index
    %c3 = arith.constant 3 : index
    %63 = memref.load %arg4[%c0_30, %c3] : memref<1x16xf32, #tpu.memory_space<smem>>
    %c0_31 = arith.constant 0 : index
    %c3_32 = arith.constant 3 : index
    %64 = memref.load %arg5[%c0_31, %c3_32] : memref<1x16xf32, #tpu.memory_space<smem>>
    %65 = vector.broadcast %63 : f32 to vector<2x8x8xf32>
    %66 = arith.subf %31, %65 : vector<2x8x8xf32>
    %cst_33 = arith.constant 0.000000e+00 : f32
    %67 = arith.subf %cst_33, %64 : f32
    %68 = vector.broadcast %67 : f32 to vector<2x8x8xf32>
    %69 = arith.mulf %68, %66 : vector<2x8x8xf32>
    %70 = arith.mulf %69, %66 : vector<2x8x8xf32>
    %71 = math.exp %70 : vector<2x8x8xf32>
    "tpu.trace_start"() <{level = 10 : i32, message = "man,mkn->mak"}> : () -> ()
    %cst_34 = arith.constant dense<0.000000e+00> : vector<2x8x1xf32>
    %72 = tpu.matmul %71, %32, %cst_34 {dimension_numbers = #tpu.dot_dimension_numbers<[2], [2], [1], [1], [0, 0, 0, 1, 1, 1], [0], [0]>} : vector<2x8x8xf32>, vector<2x1x8xf32>, vector<2x8x1xf32> -> vector<2x8x1xf32>
    "tpu.trace_stop"() : () -> ()
    %c0_35 = arith.constant 0 : index
    %c4 = arith.constant 4 : index
    %73 = memref.load %arg4[%c0_35, %c4] : memref<1x16xf32, #tpu.memory_space<smem>>
    %c0_36 = arith.constant 0 : index
    %c4_37 = arith.constant 4 : index
    %74 = memref.load %arg5[%c0_36, %c4_37] : memref<1x16xf32, #tpu.memory_space<smem>>
    %75 = vector.broadcast %73 : f32 to vector<2x8x8xf32>
    %76 = arith.subf %31, %75 : vector<2x8x8xf32>
    %cst_38 = arith.constant 0.000000e+00 : f32
    %77 = arith.subf %cst_38, %74 : f32
    %78 = vector.broadcast %77 : f32 to vector<2x8x8xf32>
    %79 = arith.mulf %78, %76 : vector<2x8x8xf32>
    %80 = arith.mulf %79, %76 : vector<2x8x8xf32>
    %81 = math.exp %80 : vector<2x8x8xf32>
    "tpu.trace_start"() <{level = 10 : i32, message = "man,mkn->mak"}> : () -> ()
    %cst_39 = arith.constant dense<0.000000e+00> : vector<2x8x1xf32>
    %82 = tpu.matmul %81, %32, %cst_39 {dimension_numbers = #tpu.dot_dimension_numbers<[2], [2], [1], [1], [0, 0, 0, 1, 1, 1], [0], [0]>} : vector<2x8x8xf32>, vector<2x1x8xf32>, vector<2x8x1xf32> -> vector<2x8x1xf32>
    "tpu.trace_stop"() : () -> ()
    %c0_40 = arith.constant 0 : index
    %c5 = arith.constant 5 : index
    %83 = memref.load %arg4[%c0_40, %c5] : memref<1x16xf32, #tpu.memory_space<smem>>
    %c0_41 = arith.constant 0 : index
    %c5_42 = arith.constant 5 : index
    %84 = memref.load %arg5[%c0_41, %c5_42] : memref<1x16xf32, #tpu.memory_space<smem>>
    %85 = vector.broadcast %83 : f32 to vector<2x8x8xf32>
    %86 = arith.subf %31, %85 : vector<2x8x8xf32>
    %cst_43 = arith.constant 0.000000e+00 : f32
    %87 = arith.subf %cst_43, %84 : f32
    %88 = vector.broadcast %87 : f32 to vector<2x8x8xf32>
    %89 = arith.mulf %88, %86 : vector<2x8x8xf32>
    %90 = arith.mulf %89, %86 : vector<2x8x8xf32>
    %91 = math.exp %90 : vector<2x8x8xf32>
    "tpu.trace_start"() <{level = 10 : i32, message = "man,mkn->mak"}> : () -> ()
    %cst_44 = arith.constant dense<0.000000e+00> : vector<2x8x1xf32>
    %92 = tpu.matmul %91, %32, %cst_44 {dimension_numbers = #tpu.dot_dimension_numbers<[2], [2], [1], [1], [0, 0, 0, 1, 1, 1], [0], [0]>} : vector<2x8x8xf32>, vector<2x1x8xf32>, vector<2x8x1xf32> -> vector<2x8x1xf32>
    "tpu.trace_stop"() : () -> ()
    %c0_45 = arith.constant 0 : index
    %c6 = arith.constant 6 : index
    %93 = memref.load %arg4[%c0_45, %c6] : memref<1x16xf32, #tpu.memory_space<smem>>
    %c0_46 = arith.constant 0 : index
    %c6_47 = arith.constant 6 : index
    %94 = memref.load %arg5[%c0_46, %c6_47] : memref<1x16xf32, #tpu.memory_space<smem>>
    %95 = vector.broadcast %93 : f32 to vector<2x8x8xf32>
    %96 = arith.subf %31, %95 : vector<2x8x8xf32>
    %cst_48 = arith.constant 0.000000e+00 : f32
    %97 = arith.subf %cst_48, %94 : f32
    %98 = vector.broadcast %97 : f32 to vector<2x8x8xf32>
    %99 = arith.mulf %98, %96 : vector<2x8x8xf32>
    %100 = arith.mulf %99, %96 : vector<2x8x8xf32>
    %101 = math.exp %100 : vector<2x8x8xf32>
    "tpu.trace_start"() <{level = 10 : i32, message = "man,mkn->mak"}> : () -> ()
    %cst_49 = arith.constant dense<0.000000e+00> : vector<2x8x1xf32>
    %102 = tpu.matmul %101, %32, %cst_49 {dimension_numbers = #tpu.dot_dimension_numbers<[2], [2], [1], [1], [0, 0, 0, 1, 1, 1], [0], [0]>} : vector<2x8x8xf32>, vector<2x1x8xf32>, vector<2x8x1xf32> -> vector<2x8x1xf32>
    "tpu.trace_stop"() : () -> ()
    %c0_50 = arith.constant 0 : index
    %c7 = arith.constant 7 : index
    %103 = memref.load %arg4[%c0_50, %c7] : memref<1x16xf32, #tpu.memory_space<smem>>
    %c0_51 = arith.constant 0 : index
    %c7_52 = arith.constant 7 : index
    %104 = memref.load %arg5[%c0_51, %c7_52] : memref<1x16xf32, #tpu.memory_space<smem>>
    %105 = vector.broadcast %103 : f32 to vector<2x8x8xf32>
    %106 = arith.subf %31, %105 : vector<2x8x8xf32>
    %cst_53 = arith.constant 0.000000e+00 : f32
    %107 = arith.subf %cst_53, %104 : f32
    %108 = vector.broadcast %107 : f32 to vector<2x8x8xf32>
    %109 = arith.mulf %108, %106 : vector<2x8x8xf32>
    %110 = arith.mulf %109, %106 : vector<2x8x8xf32>
    %111 = math.exp %110 : vector<2x8x8xf32>
    "tpu.trace_start"() <{level = 10 : i32, message = "man,mkn->mak"}> : () -> ()
    %cst_54 = arith.constant dense<0.000000e+00> : vector<2x8x1xf32>
    %112 = tpu.matmul %111, %32, %cst_54 {dimension_numbers = #tpu.dot_dimension_numbers<[2], [2], [1], [1], [0, 0, 0, 1, 1, 1], [0], [0]>} : vector<2x8x8xf32>, vector<2x1x8xf32>, vector<2x8x1xf32> -> vector<2x8x1xf32>
    "tpu.trace_stop"() : () -> ()
    %c0_55 = arith.constant 0 : index
    %c8 = arith.constant 8 : index
    %113 = memref.load %arg4[%c0_55, %c8] : memref<1x16xf32, #tpu.memory_space<smem>>
    %c0_56 = arith.constant 0 : index
    %c8_57 = arith.constant 8 : index
    %114 = memref.load %arg5[%c0_56, %c8_57] : memref<1x16xf32, #tpu.memory_space<smem>>
    %115 = vector.broadcast %113 : f32 to vector<2x8x8xf32>
    %116 = arith.subf %31, %115 : vector<2x8x8xf32>
    %cst_58 = arith.constant 0.000000e+00 : f32
    %117 = arith.subf %cst_58, %114 : f32
    %118 = vector.broadcast %117 : f32 to vector<2x8x8xf32>
    %119 = arith.mulf %118, %116 : vector<2x8x8xf32>
    %120 = arith.mulf %119, %116 : vector<2x8x8xf32>
    %121 = math.exp %120 : vector<2x8x8xf32>
    "tpu.trace_start"() <{level = 10 : i32, message = "man,mkn->mak"}> : () -> ()
    %cst_59 = arith.constant dense<0.000000e+00> : vector<2x8x1xf32>
    %122 = tpu.matmul %121, %32, %cst_59 {dimension_numbers = #tpu.dot_dimension_numbers<[2], [2], [1], [1], [0, 0, 0, 1, 1, 1], [0], [0]>} : vector<2x8x8xf32>, vector<2x1x8xf32>, vector<2x8x1xf32> -> vector<2x8x1xf32>
    "tpu.trace_stop"() : () -> ()
    %c0_60 = arith.constant 0 : index
    %c9 = arith.constant 9 : index
    %123 = memref.load %arg4[%c0_60, %c9] : memref<1x16xf32, #tpu.memory_space<smem>>
    %c0_61 = arith.constant 0 : index
    %c9_62 = arith.constant 9 : index
    %124 = memref.load %arg5[%c0_61, %c9_62] : memref<1x16xf32, #tpu.memory_space<smem>>
    %125 = vector.broadcast %123 : f32 to vector<2x8x8xf32>
    %126 = arith.subf %31, %125 : vector<2x8x8xf32>
    %cst_63 = arith.constant 0.000000e+00 : f32
    %127 = arith.subf %cst_63, %124 : f32
    %128 = vector.broadcast %127 : f32 to vector<2x8x8xf32>
    %129 = arith.mulf %128, %126 : vector<2x8x8xf32>
    %130 = arith.mulf %129, %126 : vector<2x8x8xf32>
    %131 = math.exp %130 : vector<2x8x8xf32>
    "tpu.trace_start"() <{level = 10 : i32, message = "man,mkn->mak"}> : () -> ()
    %cst_64 = arith.constant dense<0.000000e+00> : vector<2x8x1xf32>
    %132 = tpu.matmul %131, %32, %cst_64 {dimension_numbers = #tpu.dot_dimension_numbers<[2], [2], [1], [1], [0, 0, 0, 1, 1, 1], [0], [0]>} : vector<2x8x8xf32>, vector<2x1x8xf32>, vector<2x8x1xf32> -> vector<2x8x1xf32>
    "tpu.trace_stop"() : () -> ()
    %c0_65 = arith.constant 0 : index
    %c10 = arith.constant 10 : index
    %133 = memref.load %arg4[%c0_65, %c10] : memref<1x16xf32, #tpu.memory_space<smem>>
    %c0_66 = arith.constant 0 : index
    %c10_67 = arith.constant 10 : index
    %134 = memref.load %arg5[%c0_66, %c10_67] : memref<1x16xf32, #tpu.memory_space<smem>>
    %135 = vector.broadcast %133 : f32 to vector<2x8x8xf32>
    %136 = arith.subf %31, %135 : vector<2x8x8xf32>
    %cst_68 = arith.constant 0.000000e+00 : f32
    %137 = arith.subf %cst_68, %134 : f32
    %138 = vector.broadcast %137 : f32 to vector<2x8x8xf32>
    %139 = arith.mulf %138, %136 : vector<2x8x8xf32>
    %140 = arith.mulf %139, %136 : vector<2x8x8xf32>
    %141 = math.exp %140 : vector<2x8x8xf32>
    "tpu.trace_start"() <{level = 10 : i32, message = "man,mkn->mak"}> : () -> ()
    %cst_69 = arith.constant dense<0.000000e+00> : vector<2x8x1xf32>
    %142 = tpu.matmul %141, %32, %cst_69 {dimension_numbers = #tpu.dot_dimension_numbers<[2], [2], [1], [1], [0, 0, 0, 1, 1, 1], [0], [0]>} : vector<2x8x8xf32>, vector<2x1x8xf32>, vector<2x8x1xf32> -> vector<2x8x1xf32>
    "tpu.trace_stop"() : () -> ()
    %c0_70 = arith.constant 0 : index
    %c11 = arith.constant 11 : index
    %143 = memref.load %arg4[%c0_70, %c11] : memref<1x16xf32, #tpu.memory_space<smem>>
    %c0_71 = arith.constant 0 : index
    %c11_72 = arith.constant 11 : index
    %144 = memref.load %arg5[%c0_71, %c11_72] : memref<1x16xf32, #tpu.memory_space<smem>>
    %145 = vector.broadcast %143 : f32 to vector<2x8x8xf32>
    %146 = arith.subf %31, %145 : vector<2x8x8xf32>
    %cst_73 = arith.constant 0.000000e+00 : f32
    %147 = arith.subf %cst_73, %144 : f32
    %148 = vector.broadcast %147 : f32 to vector<2x8x8xf32>
    %149 = arith.mulf %148, %146 : vector<2x8x8xf32>
    %150 = arith.mulf %149, %146 : vector<2x8x8xf32>
    %151 = math.exp %150 : vector<2x8x8xf32>
    "tpu.trace_start"() <{level = 10 : i32, message = "man,mkn->mak"}> : () -> ()
    %cst_74 = arith.constant dense<0.000000e+00> : vector<2x8x1xf32>
    %152 = tpu.matmul %151, %32, %cst_74 {dimension_numbers = #tpu.dot_dimension_numbers<[2], [2], [1], [1], [0, 0, 0, 1, 1, 1], [0], [0]>} : vector<2x8x8xf32>, vector<2x1x8xf32>, vector<2x8x1xf32> -> vector<2x8x1xf32>
    "tpu.trace_stop"() : () -> ()
    %c0_75 = arith.constant 0 : index
    %c12 = arith.constant 12 : index
    %153 = memref.load %arg4[%c0_75, %c12] : memref<1x16xf32, #tpu.memory_space<smem>>
    %c0_76 = arith.constant 0 : index
    %c12_77 = arith.constant 12 : index
    %154 = memref.load %arg5[%c0_76, %c12_77] : memref<1x16xf32, #tpu.memory_space<smem>>
    %155 = vector.broadcast %153 : f32 to vector<2x8x8xf32>
    %156 = arith.subf %31, %155 : vector<2x8x8xf32>
    %cst_78 = arith.constant 0.000000e+00 : f32
    %157 = arith.subf %cst_78, %154 : f32
    %158 = vector.broadcast %157 : f32 to vector<2x8x8xf32>
    %159 = arith.mulf %158, %156 : vector<2x8x8xf32>
    %160 = arith.mulf %159, %156 : vector<2x8x8xf32>
    %161 = math.exp %160 : vector<2x8x8xf32>
    "tpu.trace_start"() <{level = 10 : i32, message = "man,mkn->mak"}> : () -> ()
    %cst_79 = arith.constant dense<0.000000e+00> : vector<2x8x1xf32>
    %162 = tpu.matmul %161, %32, %cst_79 {dimension_numbers = #tpu.dot_dimension_numbers<[2], [2], [1], [1], [0, 0, 0, 1, 1, 1], [0], [0]>} : vector<2x8x8xf32>, vector<2x1x8xf32>, vector<2x8x1xf32> -> vector<2x8x1xf32>
    "tpu.trace_stop"() : () -> ()
    %c0_80 = arith.constant 0 : index
    %c13 = arith.constant 13 : index
    %163 = memref.load %arg4[%c0_80, %c13] : memref<1x16xf32, #tpu.memory_space<smem>>
    %c0_81 = arith.constant 0 : index
    %c13_82 = arith.constant 13 : index
    %164 = memref.load %arg5[%c0_81, %c13_82] : memref<1x16xf32, #tpu.memory_space<smem>>
    %165 = vector.broadcast %163 : f32 to vector<2x8x8xf32>
    %166 = arith.subf %31, %165 : vector<2x8x8xf32>
    %cst_83 = arith.constant 0.000000e+00 : f32
    %167 = arith.subf %cst_83, %164 : f32
    %168 = vector.broadcast %167 : f32 to vector<2x8x8xf32>
    %169 = arith.mulf %168, %166 : vector<2x8x8xf32>
    %170 = arith.mulf %169, %166 : vector<2x8x8xf32>
    %171 = math.exp %170 : vector<2x8x8xf32>
    "tpu.trace_start"() <{level = 10 : i32, message = "man,mkn->mak"}> : () -> ()
    %cst_84 = arith.constant dense<0.000000e+00> : vector<2x8x1xf32>
    %172 = tpu.matmul %171, %32, %cst_84 {dimension_numbers = #tpu.dot_dimension_numbers<[2], [2], [1], [1], [0, 0, 0, 1, 1, 1], [0], [0]>} : vector<2x8x8xf32>, vector<2x1x8xf32>, vector<2x8x1xf32> -> vector<2x8x1xf32>
    "tpu.trace_stop"() : () -> ()
    %c0_85 = arith.constant 0 : index
    %c14 = arith.constant 14 : index
    %173 = memref.load %arg4[%c0_85, %c14] : memref<1x16xf32, #tpu.memory_space<smem>>
    %c0_86 = arith.constant 0 : index
    %c14_87 = arith.constant 14 : index
    %174 = memref.load %arg5[%c0_86, %c14_87] : memref<1x16xf32, #tpu.memory_space<smem>>
    %175 = vector.broadcast %173 : f32 to vector<2x8x8xf32>
    %176 = arith.subf %31, %175 : vector<2x8x8xf32>
    %cst_88 = arith.constant 0.000000e+00 : f32
    %177 = arith.subf %cst_88, %174 : f32
    %178 = vector.broadcast %177 : f32 to vector<2x8x8xf32>
    %179 = arith.mulf %178, %176 : vector<2x8x8xf32>
    %180 = arith.mulf %179, %176 : vector<2x8x8xf32>
    %181 = math.exp %180 : vector<2x8x8xf32>
    "tpu.trace_start"() <{level = 10 : i32, message = "man,mkn->mak"}> : () -> ()
    %cst_89 = arith.constant dense<0.000000e+00> : vector<2x8x1xf32>
    %182 = tpu.matmul %181, %32, %cst_89 {dimension_numbers = #tpu.dot_dimension_numbers<[2], [2], [1], [1], [0, 0, 0, 1, 1, 1], [0], [0]>} : vector<2x8x8xf32>, vector<2x1x8xf32>, vector<2x8x1xf32> -> vector<2x8x1xf32>
    "tpu.trace_stop"() : () -> ()
    %c0_90 = arith.constant 0 : index
    %c15 = arith.constant 15 : index
    %183 = memref.load %arg4[%c0_90, %c15] : memref<1x16xf32, #tpu.memory_space<smem>>
    %c0_91 = arith.constant 0 : index
    %c15_92 = arith.constant 15 : index
    %184 = memref.load %arg5[%c0_91, %c15_92] : memref<1x16xf32, #tpu.memory_space<smem>>
    %185 = vector.broadcast %183 : f32 to vector<2x8x8xf32>
    %186 = arith.subf %31, %185 : vector<2x8x8xf32>
    %cst_93 = arith.constant 0.000000e+00 : f32
    %187 = arith.subf %cst_93, %184 : f32
    %188 = vector.broadcast %187 : f32 to vector<2x8x8xf32>
    %189 = arith.mulf %188, %186 : vector<2x8x8xf32>
    %190 = arith.mulf %189, %186 : vector<2x8x8xf32>
    %191 = math.exp %190 : vector<2x8x8xf32>
    "tpu.trace_start"() <{level = 10 : i32, message = "man,mkn->mak"}> : () -> ()
    %cst_94 = arith.constant dense<0.000000e+00> : vector<2x8x1xf32>
    %192 = tpu.matmul %191, %32, %cst_94 {dimension_numbers = #tpu.dot_dimension_numbers<[2], [2], [1], [1], [0, 0, 0, 1, 1, 1], [0], [0]>} : vector<2x8x8xf32>, vector<2x1x8xf32>, vector<2x8x1xf32> -> vector<2x8x1xf32>
    "tpu.trace_stop"() : () -> ()
    %c0_95 = arith.constant 0 : index
    %c0_96 = arith.constant 0 : index
    %c0_97 = arith.constant 0 : index
    %193 = vector.load %arg11[%c0_95, %c0_96, %c0_97] : memref<2x8x16xf32, #tpu.memory_space<vmem>>, vector<2x8x16xf32>
    %194 = tpu.concatenate %42, %52, %62, %72, %82, %92, %102, %112, %122, %132, %142, %152, %162, %172, %182, %192 in 2 : vector<2x8x1xf32>, vector<2x8x1xf32>, vector<2x8x1xf32>, vector<2x8x1xf32>, vector<2x8x1xf32>, vector<2x8x1xf32>, vector<2x8x1xf32>, vector<2x8x1xf32>, vector<2x8x1xf32>, vector<2x8x1xf32>, vector<2x8x1xf32>, vector<2x8x1xf32>, vector<2x8x1xf32>, vector<2x8x1xf32>, vector<2x8x1xf32>, vector<2x8x1xf32> -> vector<2x8x16xf32>
    %195 = arith.addf %193, %194 : vector<2x8x16xf32>
    %c0_98 = arith.constant 0 : index
    %c0_99 = arith.constant 0 : index
    %c0_100 = arith.constant 0 : index
    %196 = vector.load %arg11[%c0_98, %c0_99, %c0_100] : memref<2x8x16xf32, #tpu.memory_space<vmem>>, vector<2x8x16xf32>
    tpu.vector_store %arg11[%c0_98, %c0_99, %c0_100], %195 {strides = array<i32>} : memref<2x8x16xf32, #tpu.memory_space<vmem>>, vector<2x8x16xf32>,
    %c0_i32_101 = arith.constant 0 : i32
    %197 = arith.cmpi eq, %arg1, %c0_i32_101 : i32
    %198 = arith.extui %197 : i1 to i32
    %c0_i32_102 = arith.constant 0 : i32
    %199 = arith.cmpi ne, %198, %c0_i32_102 : i32
    scf.if %199 {
      %c0_103 = arith.constant 0 : index
      %c0_104 = arith.constant 0 : index
      %c0_105 = arith.constant 0 : index
      %200 = vector.load %arg11[%c0_103, %c0_104, %c0_105] : memref<2x8x16xf32, #tpu.memory_space<vmem>>, vector<2x8x16xf32>
      %c0_106 = arith.constant 0 : index
      %c0_107 = arith.constant 0 : index
      %c0_108 = arith.constant 0 : index
      %201 = vector.load %arg3[%c0_106, %c0_107, %c0_108] : memref<2x8x16xf32, #tpu.memory_space<vmem>>, vector<2x8x16xf32>
      %202 = arith.mulf %200, %201 : vector<2x8x16xf32>
      %c0_109 = arith.constant 0 : index
      %c0_110 = arith.constant 0 : index
      %203 = vector.load %arg6[%c0_109, %c0_110] : memref<16x32xf32, #tpu.memory_space<vmem>>, vector<16x32xf32>
      %204 = vector.shape_cast %203 : vector<16x32xf32> to vector<1x16x32xf32>
      %205 = vector.broadcast %204 : vector<1x16x32xf32> to vector<2x16x32xf32>
      "tpu.trace_start"() <{level = 10 : i32, message = "maf,mfh->mah"}> : () -> ()
      %cst_111 = arith.constant dense<0.000000e+00> : vector<2x8x32xf32>
      %206 = tpu.matmul %202, %205, %cst_111 {dimension_numbers = #tpu.dot_dimension_numbers<[2], [1], [1], [2], [0, 0, 0, 1, 1, 2], [0], [0]>} : vector<2x8x16xf32>, vector<2x16x32xf32>, vector<2x8x32xf32> -> vector<2x8x32xf32>
      "tpu.trace_stop"() : () -> ()
      %c0_112 = arith.constant 0 : index
      %c0_113 = arith.constant 0 : index
      %207 = vector.load %arg7[%c0_112, %c0_113] : memref<1x32xf32, #tpu.memory_space<vmem>>, vector<1x32xf32>
      %208 = vector.shape_cast %207 : vector<1x32xf32> to vector<1x1x32xf32>
      %209 = vector.broadcast %208 : vector<1x1x32xf32> to vector<2x8x32xf32>
      %210 = arith.addf %206, %209 : vector<2x8x32xf32>
      %211 = math.tanh %210 : vector<2x8x32xf32>
      %c0_114 = arith.constant 0 : index
      %c0_115 = arith.constant 0 : index
      %212 = vector.load %arg8[%c0_114, %c0_115] : memref<32x3xf32, #tpu.memory_space<vmem>>, vector<32x3xf32>
      %213 = vector.shape_cast %212 : vector<32x3xf32> to vector<1x32x3xf32>
      %214 = vector.broadcast %213 : vector<1x32x3xf32> to vector<2x32x3xf32>
      "tpu.trace_start"() <{level = 10 : i32, message = "mah,mho->mao"}> : () -> ()
      %cst_116 = arith.constant dense<0.000000e+00> : vector<2x8x3xf32>
      %215 = tpu.matmul %211, %214, %cst_116 {dimension_numbers = #tpu.dot_dimension_numbers<[2], [1], [1], [2], [0, 0, 0, 1, 1, 2], [0], [0]>} : vector<2x8x32xf32>, vector<2x32x3xf32>, vector<2x8x3xf32> -> vector<2x8x3xf32>
      "tpu.trace_stop"() : () -> ()
      %c0_117 = arith.constant 0 : index
      %c0_118 = arith.constant 0 : index
      %216 = vector.load %arg9[%c0_117, %c0_118] : memref<1x3xf32, #tpu.memory_space<vmem>>, vector<1x3xf32>
      %217 = vector.shape_cast %216 : vector<1x3xf32> to vector<1x1x3xf32>
      %218 = vector.broadcast %217 : vector<1x1x3xf32> to vector<2x8x3xf32>
      %219 = arith.addf %215, %218 : vector<2x8x3xf32>
      %220 = vector.extract_strided_slice %219 {offsets = [0, 0, 2], sizes = [2, 8, 1], strides = [1, 1, 1]} : vector<2x8x3xf32> to vector<2x8x1xf32>
      %cst_119 = arith.constant dense<0.000000e+00> : vector<2x1xf32>
      %221 = vector.multi_reduction <add>, %220, %cst_119 [1] : vector<2x8x1xf32> to vector<2x1xf32>
      %222 = vector.extract_strided_slice %219 {offsets = [0, 0, 0], sizes = [2, 8, 1], strides = [1, 1, 1]} : vector<2x8x3xf32> to vector<2x8x1xf32>
      %223 = vector.broadcast %222 : vector<2x8x1xf32> to vector<2x8x3xf32>
      %224 = arith.mulf %223, %3 : vector<2x8x3xf32>
      %cst_120 = arith.constant dense<0.000000e+00> : vector<2x3xf32>
      %225 = vector.multi_reduction <add>, %224, %cst_120 [1] : vector<2x8x3xf32> to vector<2x3xf32>
      %226 = vector.extract_strided_slice %219 {offsets = [0, 0, 1], sizes = [2, 8, 1], strides = [1, 1, 1]} : vector<2x8x3xf32> to vector<2x8x1xf32>
      %227 = vector.broadcast %226 : vector<2x8x1xf32> to vector<2x8x3xf32>
      %228 = arith.mulf %227, %3 : vector<2x8x3xf32>
      %cst_121 = arith.constant dense<0.000000e+00> : vector<2x3xf32>
      %229 = vector.multi_reduction <add>, %228, %cst_121 [1] : vector<2x8x3xf32> to vector<2x3xf32>
      %230 = vector.extract_strided_slice %225 {offsets = [0, 1], sizes = [2, 1], strides = [1, 1]} : vector<2x3xf32> to vector<2x1xf32>
      %231 = vector.extract_strided_slice %229 {offsets = [0, 2], sizes = [2, 1], strides = [1, 1]} : vector<2x3xf32> to vector<2x1xf32>
      %232 = arith.mulf %230, %231 : vector<2x1xf32>
      %233 = vector.extract_strided_slice %225 {offsets = [0, 2], sizes = [2, 1], strides = [1, 1]} : vector<2x3xf32> to vector<2x1xf32>
      %234 = vector.extract_strided_slice %229 {offsets = [0, 1], sizes = [2, 1], strides = [1, 1]} : vector<2x3xf32> to vector<2x1xf32>
      %235 = arith.mulf %233, %234 : vector<2x1xf32>
      %236 = arith.subf %232, %235 : vector<2x1xf32>
      %237 = vector.extract_strided_slice %225 {offsets = [0, 2], sizes = [2, 1], strides = [1, 1]} : vector<2x3xf32> to vector<2x1xf32>
      %238 = vector.extract_strided_slice %229 {offsets = [0, 0], sizes = [2, 1], strides = [1, 1]} : vector<2x3xf32> to vector<2x1xf32>
      %239 = arith.mulf %237, %238 : vector<2x1xf32>
      %240 = vector.extract_strided_slice %225 {offsets = [0, 0], sizes = [2, 1], strides = [1, 1]} : vector<2x3xf32> to vector<2x1xf32>
      %241 = vector.extract_strided_slice %229 {offsets = [0, 2], sizes = [2, 1], strides = [1, 1]} : vector<2x3xf32> to vector<2x1xf32>
      %242 = arith.mulf %240, %241 : vector<2x1xf32>
      %243 = arith.subf %239, %242 : vector<2x1xf32>
      %244 = vector.extract_strided_slice %225 {offsets = [0, 0], sizes = [2, 1], strides = [1, 1]} : vector<2x3xf32> to vector<2x1xf32>
      %245 = vector.extract_strided_slice %229 {offsets = [0, 1], sizes = [2, 1], strides = [1, 1]} : vector<2x3xf32> to vector<2x1xf32>
      %246 = arith.mulf %244, %245 : vector<2x1xf32>
      %247 = vector.extract_strided_slice %225 {offsets = [0, 1], sizes = [2, 1], strides = [1, 1]} : vector<2x3xf32> to vector<2x1xf32>
      %248 = vector.extract_strided_slice %229 {offsets = [0, 0], sizes = [2, 1], strides = [1, 1]} : vector<2x3xf32> to vector<2x1xf32>
      %249 = arith.mulf %247, %248 : vector<2x1xf32>
      %250 = arith.subf %246, %249 : vector<2x1xf32>
      %251 = tpu.concatenate %236, %243, %250 in 1 : vector<2x1xf32>, vector<2x1xf32>, vector<2x1xf32> -> vector<2x3xf32>
      %252 = arith.addf %225, %229 : vector<2x3xf32>
      %253 = vector.broadcast %221 : vector<2x1xf32> to vector<2x3xf32>
      %254 = arith.mulf %253, %251 : vector<2x3xf32>
      %255 = arith.addf %252, %254 : vector<2x3xf32>
      %c0_122 = arith.constant 0 : index
      %c0_123 = arith.constant 0 : index
      %256 = vector.load %arg10[%c0_122, %c0_123] : memref<2x3xf32, #tpu.memory_space<vmem>>, vector<2x3xf32>
      tpu.vector_store %arg10[%c0_122, %c0_123], %255 {strides = array<i32>} : memref<2x3xf32, #tpu.memory_space<vmem>>, vector<2x3xf32>,
    } else {
    }
    return
  }
  func.func @transform_0(%arg0: i32, %arg1: i32) -> (i32, i32, i32) {
    %c0_i32 = arith.constant 0 : i32
    %c0_i32_0 = arith.constant 0 : i32
    %c0_i32_1 = arith.constant 0 : i32
    return %arg0, %c0_i32, %c0_i32_0 : i32, i32, i32
  }
  func.func @transform_1(%arg0: i32, %arg1: i32) -> (i32, i32, i32) {
    %c0_i32 = arith.constant 0 : i32
    %c0_i32_0 = arith.constant 0 : i32
    %c0_i32_1 = arith.constant 0 : i32
    return %arg0, %c0_i32, %c0_i32_0 : i32, i32, i32
  }
  func.func @transform_2(%arg0: i32, %arg1: i32) -> (i32, i32) {
    %c0_i32 = arith.constant 0 : i32
    %c0_i32_0 = arith.constant 0 : i32
    %c0_i32_1 = arith.constant 0 : i32
    return %c0_i32, %c0_i32_0 : i32, i32
  }
  func.func @transform_3(%arg0: i32, %arg1: i32) -> (i32, i32) {
    %c0_i32 = arith.constant 0 : i32
    %c0_i32_0 = arith.constant 0 : i32
    %c0_i32_1 = arith.constant 0 : i32
    return %c0_i32, %c0_i32_0 : i32, i32
  }
  func.func @transform_4(%arg0: i32, %arg1: i32) -> (i32, i32) {
    %c0_i32 = arith.constant 0 : i32
    %c0_i32_0 = arith.constant 0 : i32
    %c0_i32_1 = arith.constant 0 : i32
    return %c0_i32, %c0_i32_0 : i32, i32
  }
  func.func @transform_5(%arg0: i32, %arg1: i32) -> (i32, i32) {
    %c0_i32 = arith.constant 0 : i32
    %c0_i32_0 = arith.constant 0 : i32
    %c0_i32_1 = arith.constant 0 : i32
    return %c0_i32, %c0_i32_0 : i32, i32
  }
  func.func @transform_6(%arg0: i32, %arg1: i32) -> (i32, i32) {
    %c0_i32 = arith.constant 0 : i32
    %c0_i32_0 = arith.constant 0 : i32
    %c0_i32_1 = arith.constant 0 : i32
    return %c0_i32, %c0_i32_0 : i32, i32
  }
  func.func @transform_7(%arg0: i32, %arg1: i32) -> (i32, i32) {
    %c0_i32 = arith.constant 0 : i32
    %c0_i32_0 = arith.constant 0 : i32
    %c0_i32_1 = arith.constant 0 : i32
    return %c0_i32, %c0_i32_0 : i32, i32
  }
  func.func @transform_8(%arg0: i32, %arg1: i32) -> (i32, i32) {
    %c0_i32 = arith.constant 0 : i32
    %c0_i32_0 = arith.constant 0 : i32
    return %arg0, %c0_i32 : i32, i32
  }
}

</mosaic_0001>

<bundles_post_ra>
// kernel: tpu_custom_call.1
= control target key start
LH: loop header
LB: loop body
LE: loop exit
PB: predicated region body
PF: predicated region fallthrough
CT: control target
= control target key end

     0   :  { %13 = vsyncpa [#allocation5], 0  ;;  %s1598_s0 = inlined_call_operand.vmem [shape: f32[2,8,3], index: 0, kind: input, shape index: {}]   ;;  %s1599_s1 = inlined_call_operand.vmem [shape: f32[2,8,16], index: 1, kind: input, shape index: {}]   ;;  %s1600_s2 = inlined_call_operand.vmem [shape: f32[1,16], index: 2, kind: input, shape index: {}]   ;;  %s1601_s3 = inlined_call_operand.vmem [shape: f32[1,16], index: 3, kind: input, shape index: {}]   ;;  %s1602_s4 = inlined_call_operand.vmem [shape: f32[16,32], index: 4, kind: input, shape index: {}]   ;;  %s1603_s5 = inlined_call_operand.vmem [shape: f32[1,32], index: 5, kind: input, shape index: {}]   ;;  %s1604_s6 = inlined_call_operand.vmem [shape: f32[32,3], index: 6, kind: input, shape index: {}]   ;;  %s1605_s7 = inlined_call_operand.vmem [shape: f32[1,3], index: 7, kind: input, shape index: {}]   ;;  %s1606_s8 = inlined_call_operand.hbm [shape: f32[2,3], index: 8, kind: output, shape index: {}]  }
   0x1   :  { %14 = vsyncpa [#allocation7], 0 }
   0x2   :  { %15 = vsyncpa [#allocation4], 0  ;;  %s25_s29 = sshll.u32 %s1600_s2, 4  ;;  %s34_s10 = sshll.u32 %s1601_s3, 4  ;;  %s26_s29 = int_to_ptr.vmem [resolvable:$true] %s25_s29  ;;  %s35_s10 = int_to_ptr.vmem [resolvable:$true] %s34_s10 }
   0x3   :  { %s1210_s11 = smov [#allocation3]   ;;  %s1211_s12 = smov [#allocation6]  }
   0x4   :  { %28 = dma.vmem_to_smem %s26_s29, 16, %s1210_s11, [#allocation5]  }
   0x5   :  { %37 = dma.vmem_to_smem %s35_s10, 16, %s1211_s12, [#allocation7]  }
   0x6   :  { %1204 = dma.done.wait [#allocation5], 16  }
   0x7   :  { %1205 = vsyncadd [#allocation5], 4294967280 }
   0x8   :  { %1206 = dma.done.wait [#allocation7], 16  }
   0x9   :  { %1207 = vsyncadd [#allocation7], 4294967280 }
   0xa   :  { %54 = sfence }
   0xb   :  { %v63_v0 = vld [vmem:[%s1598_s0 + $0x8] sm:$0xff]  ;;  %vm64_vm0 = vcmask 23552   ;;  %v62_v1 = vld [vmem:[%s1598_s0] sm:$0xff]  ;;  %v1212_v3 = vmov 8.0   ;;  %vm114_vm2 = vcmask 31744   ;;  %vm123_vm3 = vcmask 39936  }
   0xc   :  { %v72_v2 = vsel %vm64_vm0, %v63_v0, 0.0  ;;  %1080 = vrcp.f32 %v1212_v3  ;;  %v65_v4 = vsel %vm64_vm0, %v62_v1, 0.0  ;;  %s1308_s3 = sld [smem:[#allocation3 + $0x1]]  ;;  %vm217_vm8 = vcmask 64512  }
   0xd   :  { %v73_v5 = vrot.slane %v72_v2, 4  ;;  %v66_v6 = vrot.slane %v65_v4, 4  ;;  %s1014_s16 = sld [smem:[#allocation6 + $0x1]]  ;;  %vm661_vm9 = vcmask 7168   ;;  %vm664_vm10 = vcmask 15360  }
   0xe   :  { %s1018_s17 = sld [smem:[#allocation6 + $0x3]]  ;;  %vm673_vm11 = vcmask 48128   ;;  %vm676_vm12 = vcmask 56320   ;;  %vm59_vm13 = vcmask 130048   ;;  %vm681_vm14 = vcmask 72704  }
   0xf   :  { %v74_v7 = vadd.f32 %v73_v5, %v72_v2  ;;  %v67_v8 = vadd.f32 %v66_v6, %v65_v4  ;;  %s1310_s18 = sld [smem:[#allocation3 + $0x3]]  ;;  %vm684_vm15 = vcmask 80896  }
  0x10   :  { %s1312_s19 = sld [smem:[#allocation3 + $0x2]] }
  0x11   :  { %v75_v9 = vrot.slane %v74_v7, 2  ;;  %v68_v10 = vrot.slane %v67_v8, 2  ;;  %s1314_s20 = sld [smem:[#allocation6 + $0x2]] }
  0x12   :  { %v1081_v11 = vpop.eup %1080  ;;  %s1316_s21 = sld [smem:[#allocation6 + $0x4]]  ;;  %v226_v61 = vstv %s1308_s3 }
  0x13   :  { %v76_v12 = vadd.f32 %v75_v9, %v74_v7  ;;  %v80_v13 = vmul.f32 8.0, %v1081_v11  ;;  %v69_v14 = vadd.f32 %v68_v10, %v67_v8  ;;  %vm84_vm1 = vweird.f32 %v1081_v11  ;;  %s1318_s22 = sld [smem:[#allocation3 + $0x4]] }
  0x14   :  { %s229_s23 = ssub.f32 0.0, %s1014_s16 }
  0x15   :  { %v77_v15 = vrot.slane %v76_v12, 1  ;;  %v81_v16 = vsub.f32 1.0, %v80_v13  ;;  %v70_v17 = vrot.slane %v69_v14, 1  ;;  %s271_s24 = ssub.f32 0.0, %s1018_s17  ;;  %v268_v62 = vstv %s1310_s18 }
  0x16   :  { %s1320_s25 = sld [smem:[#allocation3 + $0x6]]  ;;  %v247_v2 = vstv %s1312_s19 }
  0x17   :  { %v82_v18 = vmul.f32 %v1081_v11, %v81_v16  ;;  %v78_v19 = vadd.f32 %v77_v15, %v76_v12  ;;  %v71_v20 = vadd.f32 %v70_v17, %v69_v14  ;;  %s250_s26 = ssub.f32 0.0, %s1314_s20 }
  0x18   :  { %s292_s27 = ssub.f32 0.0, %s1316_s21 }
  0x19   :  { %v83_v21 = vadd.f32 %v1081_v11, %v82_v18  ;;  %v289_v5 = vstv %s1318_s22  ;;  %s1328_s28 = sld [smem:[#allocation6 + $0x6]]  ;;  %v251_v10 = vstv %s250_s26 }
  0x1a   :  { %v293_v14 = vstv %s292_s27  ;;  %s1340_s29 = sld [smem:[#allocation6 + $0x5]] }
  0x1b   :  { %v85_v22 = vsel %vm84_vm1, %v1081_v11, %v83_v21  ;;  %s1342_s30 = sld [smem:[#allocation6 + $0x7]]  ;;  %vm687_vm1 = vcmask 89088  }
  0x1c   :  { %v87_v23 = vmul.f32 %v85_v22, %v78_v19  ;;  %v86_v24 = vmul.f32 %v85_v22, %v71_v20  ;;  %s1344_s9 = sld [smem:[#allocation3 + $0x7]] }
  0x1d   :  { %s1346_s10 = sld [smem:[#allocation3 + $0x5]] }
  0x1e   :  { %v95_v25 = vsub.f32 %v63_v0, %v87_v23  ;;  %v94_v26 = vsub.f32 %v62_v1, %v86_v24  ;;  %v230_v0 = vstv %s229_s23  ;;  %v272_v1 = vstv %s271_s24  ;;  %s1357_s14 = sld [smem:[#allocation3 + $0x9]] }
  0x1f   :  { %s334_s11 = ssub.f32 0.0, %s1328_s28 }
  0x20   :  { %v105_v27 = vmul.f32 %v95_v25, %v95_v25  ;;  %v104_v28 = vmul.f32 %v94_v26, %v94_v26  ;;  %v118_v31 = vmul.f32 -2.0, %v95_v25  ;;  %v117_v32 = vmul.f32 -2.0, %v94_v26  ;;  %s313_s12 = ssub.f32 0.0, %s1340_s29 }
  0x21   :  { %s355_s13 = ssub.f32 0.0, %s1342_s30 }
  0x22   :  { %v109_v29 = vsel %vm64_vm0, %v105_v27, 0.0  ;;  %v106_v30 = vsel %vm64_vm0, %v104_v28, 0.0  ;;  %v120_v33 = vsel %vm64_vm0, %v118_v31, 1.0  ;;  %v119_v34 = vsel %vm64_vm0, %v117_v32, 1.0  ;;  %s1359_s2 = sld [smem:[#allocation6 + $0x9]] }
  0x23   :  { %110 = vadd.xlane.f32.xlu0 %v109_v29  ;;  %107 = vadd.xlane.f32.xlu1 %v106_v30  ;;  %v331_v28 = vstv %s1320_s25  ;;  %s1367_s15 = sld [smem:[#allocation6 + $0x8]] }
  0x24   :  { %s1369_s3 = sld [smem:[#allocation6 + $0xa]] }
  0x25   :  { %s1371_s16 = sld [smem:[#allocation3 + $0xa]] }
  0x26   :  { %s1373_s17 = sld [smem:[#allocation3 + $0x8]] }
  0x27   :  { %s1387_s21 = sld [smem:[#allocation3 + $0xc]] }
  0x28   :  { %s397_s18 = ssub.f32 0.0, %s1359_s2 }
  0x29   :  { %s376_s19 = ssub.f32 0.0, %s1367_s15 }
  0x2a   :  { %s418_s20 = ssub.f32 0.0, %s1369_s3  ;;  %s1213_s3 = smov 1  }
  0x2b   :  { %102 = vadd.xlane.f32.xlu0 %v109_v29  ;;  %99 = vadd.xlane.f32.xlu1 %v106_v30  ;;  %s1389_s22 = sld [smem:[#allocation6 + $0xc]] }
  0x2c   :  { %s1397_s23 = sld [smem:[#allocation3 + $0xb]] }
  0x2d   :  { %s1399_s24 = sld [smem:[#allocation6 + $0xd]] }
  0x2e   :  { %s1401_s25 = sld [smem:[#allocation3 + $0xd]] }
  0x2f   :  { %s1403_s26 = sld [smem:[#allocation6 + $0xb]] }
  0x30   :  { %s1415_s29 = sld [smem:[#allocation3 + $0xf]] }
  0x31   :  { %s460_s27 = ssub.f32 0.0, %s1389_s22  ;;  %s1220_s22 = smov 9  }
  0x33   :  { %s481_s28 = ssub.f32 0.0, %s1399_s24  ;;  %s1222_s24 = smov 10  }
  0x35   :  { %s439_s30 = ssub.f32 0.0, %s1403_s26  ;;  %s1224_s26 = smov 11  }
  0x96   :  { %v111_v35 = vpop.xlane.xlu0 %110  ;;  %v108_v36 = vpop.xlane.xlu1 %107 }
  0x97   :  { %v122_v37 = vsel %vm114_vm2, %v120_v33, %v111_v35  ;;  %v121_v38 = vsel %vm114_vm2, %v119_v34, %v108_v36 }
  0x98   :  { %1011 = vmatpush.xpose.msk.msra.mxu1 %vm123_vm3, %v122_v37  ;;  %1009 = vmatpush.xpose.msk.msra.mxu0 %vm123_vm3, %v121_v38  ;;  %v335_v38 = vstv %s334_s11  ;;  %s1429_s11 = sld [smem:[#allocation6]] }
  0x9e   :  { %v103_v39 = vpop.xlane.xlu0 %102  ;;  %v100_v40 = vpop.xlane.xlu1 %99  ;;  %s207_s15 = ssub.f32 0.0, %s1429_s11 }
  0x9f   :  { %v113_v41 = vsel %vm64_vm0, %v95_v25, %v103_v39  ;;  %v112_v42 = vsel %vm64_vm0, %v94_v26, %v100_v40 }
  0xa0   :  { %v115_v43 = vsel %vm114_vm2, %v112_v42, 1.0  ;;  %v116_v44 = vsel %vm114_vm2, %v113_v41, 1.0 }
  0xa1   :  { %1010 = vmatmul.msk.f32.vlgmr.msra.gmra.mxu0 %vm123_vm3, %v115_v43  ;;  %1012 = vmatmul.msk.f32.vlgmr.msra.gmra.mxu1 %vm123_vm3, %v116_v44  ;;  %v352_v43 = vstv %s1344_s9  ;;  %s1420_s9 = sld [smem:[#allocation6 + $0xf]] }
 0x11e   :  { %v147_v45 = vpop.f32.mrf.mxu0  ;;  %v173_v46 = vpop.f32.mrf.mxu1 }
 0x11f   :  { %v176_v47 = vmax.f32 %v147_v45, 0.0  ;;  %v177_v48 = vmax.f32 %v173_v46, 0.0  ;;  %v310_v46 = vstv %s1346_s10  ;;  %s1427_s10 = sld [smem:[#allocation3]] }
 0x121   :  { %1082 = vrsqrt.f32 %v176_v47  ;;  %vm185_vm4 = vcmp.eq.f32.partialorder %v176_v47, inf  ;;  %v188_v3 = vand.u32 2147483648, %v176_v47  ;;  %vm187_vm5 = vcmp.eq.f32.partialorder %v176_v47, 0.0 }
 0x122   :  { %1084 = vrsqrt.f32 %v177_v48  ;;  %vm197_vm6 = vcmp.eq.f32.partialorder %v177_v48, inf  ;;  %v200_v7 = vand.u32 2147483648, %v177_v48  ;;  %vm199_vm7 = vcmp.eq.f32.partialorder %v177_v48, 0.0 }
 0x127   :  { %v1083_v49 = vpop.eup %1082 }
 0x128   :  { %v1085_v50 = vpop.eup %1084  ;;  %v179_v51 = vmul.f32 %v1083_v49, %v176_v47 }
 0x129   :  { %v191_v52 = vmul.f32 %v1085_v50, %v177_v48 }
 0x12a   :  { %v180_v53 = vmul.f32 %v1083_v49, %v179_v51  ;;  %v356_v51 = vstv %s355_s13  ;;  %s1433_s13 = sld [smem:[#allocation6 + $0xe]] }
 0x12b   :  { %v192_v54 = vmul.f32 %v1085_v50, %v191_v52 }
 0x12c   :  { %v181_v55 = vmul.f32 0.5, %v180_v53 }
 0x12d   :  { %v193_v56 = vmul.f32 0.5, %v192_v54 }
 0x12e   :  { %v182_v57 = vsub.f32 1.5, %v181_v55 }
 0x12f   :  { %v194_v58 = vsub.f32 1.5, %v193_v56 }
 0x130   :  { %v183_v59 = vmul.f32 %v1083_v49, %v182_v57  ;;  %s502_s2 = ssub.f32 0.0, %s1433_s13 }
 0x131   :  { %v195_v60 = vmul.f32 %v1085_v50, %v194_v58 }
 0x132   :  { %v184_v63 = vmul.f32 %v183_v59, %v176_v47 }
 0x133   :  { %v196_v4 = vmul.f32 %v195_v60, %v177_v48 }
 0x134   :  { %v186_v6 = vsel %vm185_vm4, %v176_v47, %v184_v63  ;;  %v314_v47 = vstv %s313_s12  ;;  %s1431_s12 = sld [smem:[#allocation3 + $0xe]]  ;;  %vm690_vm4 = vcmask 97280  }
 0x135   :  { %v1330_v8 = vsel %vm187_vm5, %v188_v3, %v186_v6  ;;  %v198_v9 = vsel %vm197_vm6, %v177_v48, %v196_v4  ;;  %vm693_vm5 = vcmask 105472   ;;  %vm696_vm6 = vcmask 113664  }
 0x136   :  { %v1332_v11 = vsel %vm199_vm7, %v200_v7, %v198_v9  ;;  %v227_v12 = vsub.f32 %v1330_v8, %v226_v61  ;;  %v269_v13 = vsub.f32 %v1330_v8, %v268_v62  ;;  %v248_v31 = vsub.f32 %v1330_v8, %v247_v2 }
 0x137   :  { %v228_v15 = vsub.f32 %v1332_v11, %v226_v61  ;;  %v270_v16 = vsub.f32 %v1332_v11, %v268_v62  ;;  %v249_v17 = vsub.f32 %v1332_v11, %v247_v2  ;;  %v291_v18 = vsub.f32 %v1332_v11, %v289_v5 }
 0x138   :  { %v231_v19 = vmul.f32 %v230_v0, %v227_v12  ;;  %v273_v25 = vmul.f32 %v272_v1, %v269_v13  ;;  %v290_v35 = vsub.f32 %v1330_v8, %v289_v5  ;;  %v333_v37 = vsub.f32 %v1332_v11, %v331_v28 }
 0x139   :  { %v232_v20 = vmul.f32 %v230_v0, %v228_v15  ;;  %v274_v21 = vmul.f32 %v272_v1, %v270_v16  ;;  %v253_v22 = vmul.f32 %v251_v10, %v249_v17  ;;  %v295_v23 = vmul.f32 %v293_v14, %v291_v18 }
 0x13a   :  { %v233_v24 = vmul.f32 %v231_v19, %v227_v12  ;;  %v275_v36 = vmul.f32 %v273_v25, %v269_v13  ;;  %v294_v40 = vmul.f32 %v293_v14, %v290_v35  ;;  %v252_v42 = vmul.f32 %v251_v10, %v248_v31 }
 0x13b   :  { %v234_v26 = vmul.f32 %v232_v20, %v228_v15  ;;  %v276_v27 = vmul.f32 %v274_v21, %v270_v16  ;;  %v297_v30 = vmul.f32 %v295_v23, %v291_v18  ;;  %v255_v34 = vmul.f32 %v253_v22, %v249_v17 }
 0x13c   :  { %v235_v29 = vmul.f32 1.442695, %v233_v24  ;;  %v277_v44 = vmul.f32 1.442695, %v275_v36  ;;  %v337_v45 = vmul.f32 %v335_v38, %v333_v37  ;;  %v296_v49 = vmul.f32 %v294_v40, %v290_v35 }
 0x13d   :  { %v237_v32 = vmul.f32 1.442695, %v234_v26  ;;  %v279_v33 = vmul.f32 1.442695, %v276_v27  ;;  %v300_v39 = vmul.f32 1.442695, %v297_v30  ;;  %v354_v50 = vsub.f32 %v1332_v11, %v352_v43 }
 0x13e   :  { %1086 = vpow2.f32 %v235_v29  ;;  %v258_v41 = vmul.f32 1.442695, %v255_v34  ;;  %v254_v54 = vmul.f32 %v252_v42, %v248_v31  ;;  %v312_v55 = vsub.f32 %v1332_v11, %v310_v46 }
 0x13f   :  { %1088 = vpow2.f32 %v237_v32  ;;  %v339_v58 = vmul.f32 %v337_v45, %v333_v37  ;;  %v332_v59 = vsub.f32 %v1330_v8, %v331_v28  ;;  %v298_v61 = vmul.f32 1.442695, %v296_v49 }
 0x140   :  { %1090 = vpow2.f32 %v279_v33  ;;  %v358_v62 = vmul.f32 %v356_v51, %v354_v50  ;;  %v256_v63 = vmul.f32 1.442695, %v254_v54  ;;  %v316_v0 = vmul.f32 %v314_v47, %v312_v55 }
 0x141   :  { %1092 = vpow2.f32 %v300_v39  ;;  %v342_v2 = vmul.f32 1.442695, %v339_v58  ;;  %v336_v3 = vmul.f32 %v335_v38, %v332_v59  ;;  %v394_v5 = vstv %s1357_s14  ;;  %s523_s14 = ssub.f32 0.0, %s1420_s9 }
 0x142   :  { %1094 = vpow2.f32 %v258_v41  ;;  %v360_v7 = vmul.f32 %v358_v62, %v354_v50  ;;  %v353_v9 = vsub.f32 %v1330_v8, %v352_v43  ;;  %v318_v12 = vmul.f32 %v316_v0, %v312_v55 }
 0x143   :  { %1096 = vpow2.f32 %v277_v44  ;;  %v311_v13 = vsub.f32 %v1330_v8, %v310_v46  ;;  %v338_v15 = vmul.f32 %v336_v3, %v332_v59  ;;  %v396_v16 = vsub.f32 %v1332_v11, %v394_v5 }
 0x144   :  { %v1087_v48 = vpop.eup %1086  ;;  %1098 = vpow2.f32 %v298_v61  ;;  %v398_v18 = vstv %s397_s18  ;;  %v363_v19 = vmul.f32 1.442695, %v360_v7  ;;  %v357_v20 = vmul.f32 %v356_v51, %v353_v9  ;;  %s1216_s18 = smov 4  }
 0x145   :  { %v1089_v52 = vpop.eup %1088  ;;  %v239_v53 = vsel %vm217_vm8, %v1087_v48, 0.0  ;;  %1100 = vpow2.f32 %v256_v63  ;;  %v321_v21 = vmul.f32 1.442695, %v318_v12  ;;  %v315_v22 = vmul.f32 %v314_v47, %v311_v13 }
 0x146   :  { %v1091_v56 = vpop.eup %1090  ;;  %v242_v57 = vsel %vm217_vm8, %v1089_v52, 0.0  ;;  %240 = vadd.xlane.f32.xlu0 %v239_v53  ;;  %1102 = vpow2.f32 %v342_v2  ;;  %v415_v23 = vstv %s1371_s16  ;;  %v340_v25 = vmul.f32 1.442695, %v338_v15  ;;  %s1214_s16 = smov 2  }
 0x147   :  { %243 = vadd.xlane.f32.xlu2 %v242_v57  ;;  %v284_v60 = vsel %vm217_vm8, %v1091_v56, 0.0  ;;  %v1093_v1 = vpop.eup %1092  ;;  %v400_v26 = vmul.f32 %v398_v18, %v396_v16  ;;  %v373_v27 = vstv %s1373_s17  ;;  %v377_v29 = vstv %s376_s19  ;;  %s1215_s17 = smov 3   ;;  %s1217_s19 = smov 6  }
 0x148   :  { %285 = vadd.xlane.f32.xlu1 %v284_v60  ;;  %v1095_v4 = vpop.eup %1094  ;;  %v305_v10 = vsel %vm217_vm8, %v1093_v1, 0.0  ;;  %1104 = vpow2.f32 %v363_v19  ;;  %v359_v31 = vmul.f32 %v357_v20, %v353_v9  ;;  %v417_v32 = vsub.f32 %v1332_v11, %v415_v23 }
 0x149   :  { %v1097_v6 = vpop.eup %1096  ;;  %v263_v14 = vsel %vm217_vm8, %v1095_v4, 0.0  ;;  %v419_v33 = vstv %s418_s20  ;;  %1106 = vpow2.f32 %v321_v21  ;;  %v317_v35 = vmul.f32 %v315_v22, %v311_v13  ;;  %s1218_s20 = smov 5  }
 0x14a   :  { %v281_v17 = vsel %vm217_vm8, %v1097_v6, 0.0  ;;  %v1099_v24 = vpop.eup %1098  ;;  %v375_v36 = vsub.f32 %v1332_v11, %v373_v27  ;;  %1108 = vpow2.f32 %v340_v25  ;;  %v402_v38 = vmul.f32 %v400_v26, %v396_v16 }
 0x14b   :  { %v1101_v28 = vpop.eup %1100  ;;  %v302_v34 = vsel %vm217_vm8, %v1099_v24, 0.0  ;;  %v395_v39 = vsub.f32 %v1330_v8, %v394_v5  ;;  %v361_v41 = vmul.f32 1.442695, %v359_v31  ;;  %v421_v42 = vmul.f32 %v419_v33, %v417_v32 }
 0x14c   :  { %v1103_v30 = vpop.eup %1102  ;;  %v260_v37 = vsel %vm217_vm8, %v1101_v28, 0.0  ;;  %v319_v43 = vmul.f32 1.442695, %v317_v35  ;;  %v379_v44 = vmul.f32 %v377_v29, %v375_v36  ;;  %v405_v46 = vmul.f32 1.442695, %v402_v38 }
 0x14d   :  { %v347_v40 = vsel %vm217_vm8, %v1103_v30, 0.0  ;;  %v399_v47 = vmul.f32 %v398_v18, %v395_v39  ;;  %v457_v49 = vstv %s1387_s21  ;;  %1110 = vpow2.f32 %v361_v41  ;;  %s1219_s21 = smov 7  }
 0x14e   :  { %306 = vadd.xlane.f32.xlu0 %v305_v10  ;;  %v1105_v45 = vpop.eup %1104  ;;  %v423_v51 = vmul.f32 %v421_v42, %v417_v32  ;;  %v416_v52 = vsub.f32 %v1330_v8, %v415_v23  ;;  %1112 = vpow2.f32 %v319_v43  ;;  %v381_v54 = vmul.f32 %v379_v44, %v375_v36 }
 0x14f   :  { %264 = vadd.xlane.f32.xlu2 %v263_v14  ;;  %v1107_v48 = vpop.eup %1106  ;;  %v368_v53 = vsel %vm217_vm8, %v1105_v45, 0.0  ;;  %v374_v55 = vsub.f32 %v1330_v8, %v373_v27  ;;  %1114 = vpow2.f32 %v405_v46  ;;  %v401_v57 = vmul.f32 %v399_v47, %v395_v39 }
 0x150   :  { %282 = vadd.xlane.f32.xlu1 %v281_v17  ;;  %v1109_v50 = vpop.eup %1108  ;;  %v326_v56 = vsel %vm217_vm8, %v1107_v48, 0.0  ;;  %v459_v58 = vsub.f32 %v1332_v11, %v457_v49  ;;  %v461_v60 = vstv %s460_s27  ;;  %v426_v61 = vmul.f32 1.442695, %v423_v51  ;;  %s1225_s27 = smov 13  }
 0x151   :  { %v344_v59 = vsel %vm217_vm8, %v1109_v50, 0.0  ;;  %v420_v62 = vmul.f32 %v419_v33, %v416_v52  ;;  %v384_v63 = vmul.f32 1.442695, %v381_v54  ;;  %v378_v0 = vmul.f32 %v377_v29, %v374_v55 }
 0x152   :  { %v478_v1 = vstv %s1401_s25  ;;  %v403_v3 = vmul.f32 1.442695, %v401_v57  ;;  %v463_v4 = vmul.f32 %v461_v60, %v459_v58  ;;  %v436_v5 = vstv %s1397_s23  ;;  %s1221_s23 = smov 8   ;;  %s1223_s25 = smov 12  }
 0x153   :  { %v1111_v2 = vpop.eup %1110  ;;  %v458_v7 = vsub.f32 %v1330_v8, %v457_v49  ;;  %1116 = vpow2.f32 %v426_v61  ;;  %v422_v10 = vmul.f32 %v420_v62, %v416_v52  ;;  %v480_v12 = vsub.f32 %v1332_v11, %v478_v1 }
 0x154   :  { %v1113_v6 = vpop.eup %1112  ;;  %v482_v13 = vstv %s481_s28  ;;  %v365_v14 = vsel %vm217_vm8, %v1111_v2, 0.0  ;;  %1118 = vpow2.f32 %v384_v63  ;;  %v380_v15 = vmul.f32 %v378_v0, %v374_v55  ;;  %s1226_s28 = smov 15  }
 0x155   :  { %v1115_v9 = vpop.eup %1114  ;;  %v438_v16 = vsub.f32 %v1332_v11, %v436_v5  ;;  %v323_v17 = vsel %vm217_vm8, %v1113_v6, 0.0  ;;  %1120 = vpow2.f32 %v403_v3  ;;  %v465_v18 = vmul.f32 %v463_v4, %v459_v58 }
 0x156   :  { %303 = vadd.xlane.f32.xlu0 %v302_v34  ;;  %v440_v19 = vstv %s439_s30  ;;  %v410_v20 = vsel %vm217_vm8, %v1115_v9, 0.0  ;;  %v462_v21 = vmul.f32 %v461_v60, %v458_v7  ;;  %v424_v22 = vmul.f32 1.442695, %v422_v10  ;;  %s998_s30 = sshll.u32 %s1606_s8, 4  ;;  %s999_s30 = int_to_ptr.hbm [resolvable:$true] %s998_s30 }
 0x157   :  { %261 = vadd.xlane.f32.xlu2 %v260_v37  ;;  %v484_v23 = vmul.f32 %v482_v13, %v480_v12  ;;  %v382_v24 = vmul.f32 1.442695, %v380_v15  ;;  %v442_v25 = vmul.f32 %v440_v19, %v438_v16  ;;  %v468_v27 = vmul.f32 1.442695, %v465_v18 }
 0x158   :  { %348 = vadd.xlane.f32.xlu1 %v347_v40  ;;  %v464_v29 = vmul.f32 %v462_v21, %v458_v7  ;;  %v520_v30 = vstv %s1415_s29  ;;  %1122 = vpow2.f32 %v424_v22  ;;  %v479_v33 = vsub.f32 %v1330_v8, %v478_v1  ;;  %s1227_s29 = smov 14  }
 0x159   :  { %v1117_v26 = vpop.eup %1116  ;;  %v486_v32 = vmul.f32 %v484_v23, %v480_v12  ;;  %1124 = vpow2.f32 %v382_v24  ;;  %v444_v35 = vmul.f32 %v442_v25, %v438_v16  ;;  %v437_v36 = vsub.f32 %v1330_v8, %v436_v5 }
 0x15a   :  { %v1119_v28 = vpop.eup %1118  ;;  %v431_v34 = vsel %vm217_vm8, %v1117_v26, 0.0  ;;  %1126 = vpow2.f32 %v468_v27  ;;  %v522_v38 = vsub.f32 %v1332_v11, %v520_v30  ;;  %v466_v40 = vmul.f32 1.442695, %v464_v29 }
 0x15b   :  { %v1121_v31 = vpop.eup %1120  ;;  %v389_v37 = vsel %vm217_vm8, %v1119_v28, 0.0  ;;  %v524_v41 = vstv %s523_s14  ;;  %v489_v42 = vmul.f32 1.442695, %v486_v32  ;;  %v483_v43 = vmul.f32 %v482_v13, %v479_v33 }
 0x15c   :  { %v407_v39 = vsel %vm217_vm8, %v1121_v31, 0.0  ;;  %v447_v44 = vmul.f32 1.442695, %v444_v35  ;;  %v441_v45 = vmul.f32 %v440_v19, %v437_v36  ;;  %v526_v47 = vmul.f32 %v524_v41, %v522_v38 }
 0x15d   :  { %v499_v48 = vstv %s1431_s12  ;;  %1128 = vpow2.f32 %v466_v40  ;;  %v204_v50 = vstv %s1427_s10  ;;  %v485_v52 = vmul.f32 %v483_v43, %v479_v33 }
 0x15e   :  { %369 = vadd.xlane.f32.xlu0 %v368_v53  ;;  %v1123_v46 = vpop.eup %1122  ;;  %1130 = vpow2.f32 %v489_v42  ;;  %v521_v53 = vsub.f32 %v1330_v8, %v520_v30  ;;  %v443_v55 = vmul.f32 %v441_v45, %v437_v36  ;;  %v528_v58 = vmul.f32 %v526_v47, %v522_v38 }
 0x15f   :  { %327 = vadd.xlane.f32.xlu2 %v326_v56  ;;  %v1125_v49 = vpop.eup %1124  ;;  %v428_v54 = vsel %vm217_vm8, %v1123_v46, 0.0  ;;  %1132 = vpow2.f32 %v447_v44  ;;  %v501_v56 = vsub.f32 %v1332_v11, %v499_v48  ;;  %v503_v60 = vstv %s502_s2 }
 0x160   :  { %345 = vadd.xlane.f32.xlu1 %v344_v59  ;;  %v1127_v51 = vpop.eup %1126  ;;  %v386_v57 = vsel %vm217_vm8, %v1125_v49, 0.0  ;;  %v206_v59 = vsub.f32 %v1332_v11, %v204_v50  ;;  %v208_v62 = vstv %s207_s15  ;;  %v487_v63 = vmul.f32 1.442695, %v485_v52 }
 0x161   :  { %v473_v61 = vsel %vm217_vm8, %v1127_v51, 0.0  ;;  %v525_v0 = vmul.f32 %v524_v41, %v521_v53  ;;  %v445_v2 = vmul.f32 1.442695, %v443_v55  ;;  %v505_v3 = vmul.f32 %v503_v60, %v501_v56 }
 0x162   :  { %v531_v5 = vmul.f32 1.442695, %v528_v58  ;;  %v210_v6 = vmul.f32 %v208_v62, %v206_v59  ;;  %1134 = vpow2.f32 %v487_v63  ;;  %v205_v10 = vsub.f32 %v1330_v8, %v204_v50 }
 0x163   :  { %v1129_v1 = vpop.eup %1128  ;;  %v527_v9 = vmul.f32 %v525_v0, %v521_v53  ;;  %1136 = vpow2.f32 %v445_v2  ;;  %v507_v12 = vmul.f32 %v505_v3, %v501_v56  ;;  %v500_v13 = vsub.f32 %v1330_v8, %v499_v48 }
 0x164   :  { %v1131_v4 = vpop.eup %1130  ;;  %1138 = vpow2.f32 %v531_v5  ;;  %v212_v15 = vmul.f32 %v210_v6, %v206_v59  ;;  %v470_v16 = vsel %vm217_vm8, %v1129_v1, 0.0  ;;  %v209_v18 = vmul.f32 %v208_v62, %v205_v10 }
 0x165   :  { %v1133_v7 = vpop.eup %1132  ;;  %v494_v11 = vsel %vm217_vm8, %v1131_v4, 0.0  ;;  %v510_v19 = vmul.f32 1.442695, %v507_v12  ;;  %vm947_vm7 = vcmask 1041409  }
 0x166   :  { %366 = vadd.xlane.f32.xlu0 %v365_v14  ;;  %v452_v14 = vsel %vm217_vm8, %v1133_v7, 0.0  ;;  %v215_v22 = vmul.f32 1.442695, %v212_v15  ;;  %v211_v25 = vmul.f32 %v209_v18, %v205_v10 }
 0x167   :  { %324 = vadd.xlane.f32.xlu2 %v323_v17  ;;  %v529_v17 = vmul.f32 1.442695, %v527_v9 }
 0x168   :  { %411 = vadd.xlane.f32.xlu1 %v410_v20  ;;  %v504_v20 = vmul.f32 %v503_v60, %v500_v13  ;;  %v1135_v21 = vpop.eup %1134  ;;  %v213_v29 = vmul.f32 1.442695, %v211_v25 }
 0x169   :  { %v1137_v23 = vpop.eup %1136  ;;  %1140 = vpow2.f32 %v529_v17  ;;  %v491_v8 = vsel %vm217_vm8, %v1135_v21, 0.0 }
 0x16a   :  { %v1139_v24 = vpop.eup %1138  ;;  %1142 = vpow2.f32 %v510_v19  ;;  %v506_v26 = vmul.f32 %v504_v20, %v500_v13  ;;  %v449_v27 = vsel %vm217_vm8, %v1137_v23, 0.0 }
 0x16b   :  { %1144 = vpow2.f32 %v215_v22  ;;  %v536_v28 = vsel %vm217_vm8, %v1139_v24, 0.0 }
 0x16c   :  { %v508_v30 = vmul.f32 1.442695, %v506_v26  ;;  %1146 = vpow2.f32 %v213_v29 }
 0x16e   :  { %432 = vadd.xlane.f32.xlu0 %v431_v34  ;;  %1148 = vpow2.f32 %v508_v30  ;;  %v717_v30 = vld [vmem:[%s1602_s4 + $0x8] sm:$0xff] }
 0x16f   :  { %390 = vadd.xlane.f32.xlu2 %v389_v37  ;;  %v1141_v31 = vpop.eup %1140  ;;  %762 = vmatpush.msra.mxu3 %v717_v30 }
 0x170   :  { %408 = vadd.xlane.f32.xlu1 %v407_v39  ;;  %v1143_v32 = vpop.eup %1142  ;;  %v533_v34 = vsel %vm217_vm8, %v1141_v31, 0.0  ;;  %v716_v31 = vld [vmem:[%s1602_s4] sm:$0xff]  ;;  %739 = vmatpush.msra.mxu2 %v717_v30  ;;  %v1230_v30 = vmov 0  }
 0x171   :  { %v1145_v33 = vpop.eup %1144  ;;  %v515_v35 = vsel %vm217_vm8, %v1143_v32, 0.0  ;;  %763 = vmatpush.msra.mxu3 %v716_v31  ;;  %1074 = vset.pattern.permute.xlu1 %v1230_v30 }
 0x172   :  { %v221_v36 = vsel %vm217_vm8, %v1145_v33, 0.0  ;;  %v1147_v37 = vpop.eup %1146  ;;  %740 = vmatpush.msra.mxu2 %v716_v31  ;;  %v1079_v31 = vld [vmem:[%s1605_s7] ss:$0 sm:$0xff] }
 0x173   :  { %v218_v39 = vsel %vm217_vm8, %v1147_v37, 0.0 }
 0x174   :  { %v1149_v38 = vpop.eup %1148 }
 0x175   :  { %v512_v40 = vsel %vm217_vm8, %v1149_v38, 0.0  ;;  %v1228_v38 = vmov 0.0  }
 0x176   :  { %429 = vadd.xlane.f32.xlu0 %v428_v54  ;;  %60 = vst.msk [vmem:[#allocation2] sm:$0xff] %vm59_vm13, %v1228_v38 }
 0x177   :  { %387 = vadd.xlane.f32.xlu2 %v386_v57  ;;  %61 = vst.msk [vmem:[#allocation2 + $0x8] sm:$0xff] %vm59_vm13, %v1228_v38 }
 0x178   :  { %474 = vadd.xlane.f32.xlu1 %v473_v61 }
 0x17e   :  { %495 = vadd.xlane.f32.xlu0 %v494_v11 }
 0x17f   :  { %453 = vadd.xlane.f32.xlu2 %v452_v14 }
 0x180   :  { %471 = vadd.xlane.f32.xlu1 %v470_v16 }
 0x186   :  { %492 = vadd.xlane.f32.xlu0 %v491_v8 }
 0x187   :  { %450 = vadd.xlane.f32.xlu2 %v449_v27 }
 0x188   :  { %537 = vadd.xlane.f32.xlu1 %v536_v28 }
 0x18e   :  { %534 = vadd.xlane.f32.xlu0 %v533_v34 }
 0x18f   :  { %516 = vadd.xlane.f32.xlu2 %v515_v35 }
 0x190   :  { %222 = vadd.xlane.f32.xlu1 %v221_v36 }
 0x196   :  { %219 = vadd.xlane.f32.xlu0 %v218_v39 }
 0x197   :  { %513 = vadd.xlane.f32.xlu2 %v512_v40 }
 0x1b9   :  { %v241_v41 = vpop.xlane.xlu0 %240 }
 0x1ba   :  { %v244_v42 = vpop.xlane.xlu2 %243  ;;  %543 = vrot.lane.b32.xlu0 %v241_v41, %s1213_s3 }
 0x1bb   :  { %v286_v43 = vpop.xlane.xlu1 %285  ;;  %545 = vrot.lane.b32.xlu2 %v244_v42, %s1213_s3 }
 0x1c1   :  { %v307_v44 = vpop.xlane.xlu0 %306 }
 0x1c2   :  { %v265_v45 = vpop.xlane.xlu2 %264 }
 0x1c3   :  { %v283_v46 = vpop.xlane.xlu1 %282  ;;  %553 = vrot.lane.b32.xlu1 %v265_v45, %s1214_s16  ;;  %561 = vrot.lane.b32.xlu2 %v286_v43, %s1215_s17 }
 0x1c4   :  { %559 = vrot.lane.b32.xlu0 %v283_v46, %s1215_s17 }
 0x1c9   :  { %v304_v47 = vpop.xlane.xlu0 %303 }
 0x1ca   :  { %v262_v48 = vpop.xlane.xlu2 %261 }
 0x1cb   :  { %v349_v49 = vpop.xlane.xlu1 %348  ;;  %569 = vrot.lane.b32.xlu1 %v307_v44, %s1216_s18  ;;  %551 = vrot.lane.b32.xlu2 %v262_v48, %s1214_s16 }
 0x1cc   :  { %585 = vrot.lane.b32.xlu0 %v349_v49, %s1217_s19 }
 0x1d1   :  { %v370_v50 = vpop.xlane.xlu0 %369 }
 0x1d2   :  { %v328_v51 = vpop.xlane.xlu2 %327 }
 0x1d3   :  { %v346_v52 = vpop.xlane.xlu1 %345  ;;  %567 = vrot.lane.b32.xlu1 %v304_v47, %s1216_s18  ;;  %577 = vrot.lane.b32.xlu2 %v328_v51, %s1218_s20 }
 0x1d4   :  { %583 = vrot.lane.b32.xlu0 %v346_v52, %s1217_s19 }
 0x1d9   :  { %v367_v53 = vpop.xlane.xlu0 %366 }
 0x1da   :  { %v325_v54 = vpop.xlane.xlu2 %324 }
 0x1db   :  { %v412_v55 = vpop.xlane.xlu1 %411  ;;  %593 = vrot.lane.b32.xlu1 %v370_v50, %s1219_s21  ;;  %575 = vrot.lane.b32.xlu2 %v325_v54, %s1218_s20 }
 0x1dc   :  { %609 = vrot.lane.b32.xlu0 %v412_v55, %s1220_s22 }
 0x1e1   :  { %v433_v57 = vpop.xlane.xlu0 %432 }
 0x1e2   :  { %v391_v56 = vpop.xlane.xlu2 %390 }
 0x1e3   :  { %v409_v58 = vpop.xlane.xlu1 %408  ;;  %591 = vrot.lane.b32.xlu1 %v367_v53, %s1219_s21  ;;  %601 = vrot.lane.b32.xlu2 %v391_v56, %s1221_s23 }
 0x1e4   :  { %607 = vrot.lane.b32.xlu0 %v409_v58, %s1220_s22  ;;  %v540_v58 = vld [vmem:[#allocation2 + $0x8] sm:$0xff] }
 0x1e9   :  { %v430_v61 = vpop.xlane.xlu0 %429 }
 0x1ea   :  { %v388_v59 = vpop.xlane.xlu2 %387 }
 0x1eb   :  { %v475_v60 = vpop.xlane.xlu1 %474  ;;  %617 = vrot.lane.b32.xlu1 %v433_v57, %s1222_s24  ;;  %599 = vrot.lane.b32.xlu2 %v388_v59, %s1221_s23 }
 0x1ec   :  { %633 = vrot.lane.b32.xlu0 %v475_v60, %s1223_s25 }
 0x1f1   :  { %v496_v0 = vpop.xlane.xlu0 %495 }
 0x1f2   :  { %v454_v62 = vpop.xlane.xlu2 %453 }
 0x1f3   :  { %v472_v63 = vpop.xlane.xlu1 %471  ;;  %615 = vrot.lane.b32.xlu1 %v430_v61, %s1222_s24  ;;  %625 = vrot.lane.b32.xlu2 %v454_v62, %s1224_s26 }
 0x1f4   :  { %631 = vrot.lane.b32.xlu0 %v472_v63, %s1223_s25 }
 0x1f9   :  { %v493_v3 = vpop.xlane.xlu0 %492 }
 0x1fa   :  { %v451_v1 = vpop.xlane.xlu2 %450 }
 0x1fb   :  { %v538_v2 = vpop.xlane.xlu1 %537  ;;  %641 = vrot.lane.b32.xlu1 %v496_v0, %s1225_s27  ;;  %623 = vrot.lane.b32.xlu2 %v451_v1, %s1224_s26 }
 0x1fc   :  { %657 = vrot.lane.b32.xlu0 %v538_v2, %s1226_s28 }
 0x201   :  { %v535_v5 = vpop.xlane.xlu0 %534 }
 0x202   :  { %v517_v4 = vpop.xlane.xlu2 %516 }
 0x203   :  { %639 = vrot.lane.b32.xlu1 %v493_v3, %s1225_s27  ;;  %649 = vrot.lane.b32.xlu2 %v517_v4, %s1227_s29  ;;  %v223_v13 = vpop.xlane.xlu1 %222  ;;  %v713_v4 = vld [vmem:[%s1599_s1 + $0x8] sm:$0xff]  ;;  %s1231_s27 = smov 126  }
 0x209   :  { %v220_v10 = vpop.xlane.xlu0 %219 }
 0x20a   :  { %v514_v6 = vpop.xlane.xlu2 %513 }
 0x20b   :  { %655 = vrot.lane.b32.xlu1 %v535_v5, %s1226_s28  ;;  %647 = vrot.lane.b32.xlu2 %v514_v6, %s1227_s29 }
 0x215   :  { %v546_v7 = vpop.permute.xlu2 %545 }
 0x216   :  { %v663_v26 = vsel %vm661_vm9, %v223_v13, %v546_v7 }
 0x21d   :  { %v562_v9 = vpop.permute.xlu2 %561 }
 0x225   :  { %v552_v11 = vpop.permute.xlu2 %551 }
 0x22c   :  { %v544_v12 = vpop.permute.xlu0 %543 }
 0x22d   :  { %v662_v14 = vsel %vm661_vm9, %v220_v10, %v544_v12  ;;  %v578_v15 = vpop.permute.xlu2 %577 }
 0x22e   :  { %v665_v41 = vsel %vm664_vm10, %v662_v14, %v552_v11  ;;  %v539_v11 = vld [vmem:[#allocation2] sm:$0xff] }
 0x235   :  { %v554_v16 = vpop.permute.xlu1 %553  ;;  %v576_v18 = vpop.permute.xlu2 %575 }
 0x236   :  { %v560_v17 = vpop.permute.xlu0 %559  ;;  %v666_v27 = vsel %vm664_vm10, %v663_v26, %v554_v16  ;;  %v712_v16 = vld [vmem:[%s1599_s1] sm:$0xff] }
 0x237   :  { %v668_v32 = vsel %vm64_vm0, %v666_v27, %v562_v9  ;;  %v667_v43 = vsel %vm64_vm0, %v665_v41, %v560_v17 }
 0x23d   :  { %v570_v19 = vpop.permute.xlu1 %569  ;;  %v602_v22 = vpop.permute.xlu2 %601 }
 0x23e   :  { %v586_v20 = vpop.permute.xlu0 %585  ;;  %v670_v33 = vsel %vm114_vm2, %v668_v32, %v570_v19  ;;  %v773_v19 = vld [vmem:[%s1604_s6 + $0x18] sm:$0xff] }
 0x23f   :  { %v672_v35 = vsel %vm123_vm3, %v670_v33, %v578_v15  ;;  %817 = vmatpush.msrb.mxu1 %v773_v19  ;;  %794 = vmatpush.msrb.mxu0 %v773_v19 }
 0x240   :  { %v675_v39 = vsel %vm673_vm11, %v672_v35, %v586_v20  ;;  %v772_v20 = vld [vmem:[%s1604_s6 + $0x10] sm:$0xff] }
 0x241   :  { %818 = vmatpush.msrb.mxu1 %v772_v20  ;;  %795 = vmatpush.msrb.mxu0 %v772_v20  ;;  %v1233_v20 = vmov 2  }
 0x245   :  { %v568_v21 = vpop.permute.xlu1 %567  ;;  %v600_v8 = vpop.permute.xlu2 %599 }
 0x246   :  { %v584_v23 = vpop.permute.xlu0 %583  ;;  %v669_v45 = vsel %vm114_vm2, %v667_v43, %v568_v21  ;;  %vm699_vm2 = vcmask 121856   ;;  %v771_v21 = vld [vmem:[%s1604_s6 + $0x8] sm:$0xff] }
 0x247   :  { %v671_v50 = vsel %vm123_vm3, %v669_v45, %v576_v18  ;;  %819 = vmatpush.msrb.mxu1 %v771_v21  ;;  %796 = vmatpush.msrb.mxu0 %v771_v21  ;;  %vm778_vm3 = vcmask 261120   ;;  %v1155_v45 = vld [vmem:[%s1598_s0 + $0x8] sm:$0xff] }
 0x248   :  { %v674_v52 = vsel %vm673_vm11, %v671_v50, %v584_v23  ;;  %v1078_v23 = vld [vmem:[%s1603_s5] ss:$0 sm:$0xff] }
 0x24d   :  { %v594_v24 = vpop.permute.xlu1 %593  ;;  %v626_v34 = vpop.permute.xlu2 %625 }
 0x24e   :  { %v610_v25 = vpop.permute.xlu0 %609  ;;  %v678_v40 = vsel %vm676_vm12, %v675_v39, %v594_v24 }
 0x24f   :  { %v680_v42 = vsel %vm217_vm8, %v678_v40, %v602_v22  ;;  %v770_v22 = vld [vmem:[%s1604_s6] sm:$0xff] }
 0x250   :  { %v683_v47 = vsel %vm681_vm14, %v680_v42, %v610_v25  ;;  %820 = vmatpush.msrb.mxu1 %v770_v22  ;;  %797 = vmatpush.msrb.mxu0 %v770_v22 }
 0x255   :  { %v592_v28 = vpop.permute.xlu1 %591  ;;  %v624_v44 = vpop.permute.xlu2 %623 }
 0x256   :  { %v608_v29 = vpop.permute.xlu0 %607  ;;  %v677_v53 = vsel %vm676_vm12, %v674_v52, %v592_v28 }
 0x257   :  { %v679_v59 = vsel %vm217_vm8, %v677_v53, %v600_v8  ;;  %vm989_vm8 = vcmask 17408  }
 0x258   :  { %v682_v0 = vsel %vm681_vm14, %v679_v59, %v608_v29  ;;  %v1229_v29 = vmov 1  }
 0x259   :  { %1072 = vset.pattern.permute.xlu0 %v1229_v29  ;;  %1073 = vset.pattern.permute.xlu2 %v1229_v29 }
 0x25d   :  { %v618_v36 = vpop.permute.xlu1 %617  ;;  %v650_v56 = vpop.permute.xlu2 %649 }
 0x25e   :  { %v634_v37 = vpop.permute.xlu0 %633  ;;  %v686_v49 = vsel %vm684_vm15, %v683_v47, %v618_v36 }
 0x25f   :  { %v689_v51 = vsel %vm687_vm1, %v686_v49, %v626_v34 }
 0x260   :  { %v692_v54 = vsel %vm690_vm4, %v689_v51, %v634_v37  ;;  %v1154_v37 = vld [vmem:[%s1598_s0] sm:$0xff]  ;;  %s1232_s0 = smov 127  }
 0x265   :  { %v616_v46 = vpop.permute.xlu1 %615  ;;  %v648_v10 = vpop.permute.xlu2 %647 }
 0x266   :  { %v632_v48 = vpop.permute.xlu0 %631  ;;  %v685_v1 = vsel %vm684_vm15, %v682_v0, %v616_v46 }
 0x267   :  { %v688_v3 = vsel %vm687_vm1, %v685_v1, %v624_v44 }
 0x268   :  { %v691_v5 = vsel %vm690_vm4, %v688_v3, %v632_v48 }
 0x26d   :  { %v642_v55 = vpop.permute.xlu1 %641 }
 0x26e   :  { %v695_v57 = vsel %vm693_vm5, %v692_v54, %v642_v55  ;;  %v658_v60 = vpop.permute.xlu0 %657 }
 0x26f   :  { %v698_v61 = vsel %vm696_vm6, %v695_v57, %v650_v56 }
 0x270   :  { %v701_v62 = vsel %vm699_vm2, %v698_v61, %v658_v60 }
 0x271   :  { %v703_v63 = vadd.f32 %v701_v62, %v540_v58 }
 0x273   :  { %706 = vst.msk [vmem:[#allocation2 + $0x8] sm:$0xff] %vm59_vm13, %v703_v63 }
 0x275   :  { %v640_v2 = vpop.permute.xlu1 %639 }
 0x276   :  { %v694_v6 = vsel %vm693_vm5, %v691_v5, %v640_v2 }
 0x277   :  { %v697_v12 = vsel %vm696_vm6, %v694_v6, %v648_v10 }
 0x27a   :  { %v711_v7 = vld [vmem:[#allocation2 + $0x8] sm:$0xff] }
 0x27b   :  { %v715_v9 = vmul.f32 %v713_v4, %v711_v7 }
 0x27d   :  { %v656_v13 = vpop.permute.xlu1 %655  ;;  %1044 = vmatmul.msk.f32.vlgmr.msra.gmra.mxu3 %vm59_vm13, %v715_v9 }
 0x27e   :  { %v700_v14 = vsel %vm699_vm2, %v697_v12, %v656_v13 }
 0x27f   :  { %v702_v15 = vadd.f32 %v700_v14, %v539_v11 }
 0x281   :  { %705 = vst.msk [vmem:[#allocation2] sm:$0xff] %vm59_vm13, %v702_v15 }
 0x288   :  { %v710_v17 = vld [vmem:[#allocation2] sm:$0xff] }
 0x289   :  { %v714_v18 = vmul.f32 %v712_v16, %v710_v17 }
 0x28b   :  { %1043 = vmatmul.msk.f32.vlgmr.msra.gmra.mxu2 %vm59_vm13, %v714_v18 }
 0x300   :  { %v765_v24 = vpop.f32.mrf.mxu3 }
 0x301   :  { %v766_v25 = vadd.f32 %v1078_v23, %v765_v24 }
 0x303   :  { %1150 = vtanh.f32 %v766_v25 }
 0x309   :  { %v1151_v8 = vpop.eup %1150 }
 0x30a   :  { %1046 = vmatmul.msk.f32.vlgmr.msrb.gmra.mxu1 %vm778_vm3, %v1151_v8 }
 0x30e   :  { %v742_v26 = vpop.f32.mrf.mxu2 }
 0x30f   :  { %v743_v27 = vadd.f32 %v1078_v23, %v742_v26 }
 0x311   :  { %1152 = vtanh.f32 %v743_v27 }
 0x317   :  { %v1153_v28 = vpop.eup %1152 }
 0x318   :  { %1045 = vmatmul.msk.f32.vlgmr.msrb.gmra.mxu0 %vm778_vm3, %v1153_v28 }
 0x387   :  { %v822_v32 = vpop.f32.mrf.mxu1 }
 0x388   :  { %v1536_v33 = vadd.f32 %v1079_v31, %v822_v32 }
 0x38a   :  { %847 = vperm.xlu1 %1074, %v1536_v33   ;;  %871 = vperm.xlu0 %1072, %v1536_v33  }
 0x392   :  { %1077 = vset.pattern.permute.xlu0 %v1233_v20  ;;  %1076 = vset.pattern.permute.xlu1 %v1233_v20 }
 0x395   :  { %v799_v34 = vpop.f32.mrf.mxu0 }
 0x396   :  { %v1540_v35 = vadd.f32 %v1079_v31, %v799_v34 }
 0x398   :  { %867 = vperm.xlu2 %1073, %v1540_v35  }
 0x3a0   :  { %1075 = vset.pattern.permute.xlu2 %v1230_v30 }
 0x3a1   :  { %842 = vperm.xlu2 %1075, %v1540_v35  }
 0x3f2   :  { %v868_v36 = vpop.permute.xlu2 %867 }
 0x3f3   :  { %v874_v38 = vmul.f32 %v1154_v37, %v868_v36 }
 0x3f5   :  { %v876_v39 = vsel %vm64_vm0, %v874_v38, 0.0 }
 0x3f6   :  { %v877_v40 = vrot.slane %v876_v39, 4 }
 0x3f8   :  { %v878_v41 = vadd.f32 %v877_v40, %v876_v39 }
 0x3fa   :  { %v879_v42 = vrot.slane %v878_v41, 2 }
 0x3fb   :  { %v843_v59 = vpop.permute.xlu2 %842 }
 0x3fc   :  { %v880_v43 = vadd.f32 %v879_v42, %v878_v41  ;;  %v872_v44 = vpop.permute.xlu0 %871  ;;  %v848_v56 = vpop.permute.xlu1 %847  ;;  %v850_v61 = vmul.f32 %v1154_v37, %v843_v59 }
 0x3fd   :  { %v875_v46 = vmul.f32 %v1155_v45, %v872_v44  ;;  %v851_v57 = vmul.f32 %v1155_v45, %v848_v56 }
 0x3fe   :  { %v881_v47 = vrot.slane %v880_v43, 1  ;;  %v852_v63 = vsel %vm64_vm0, %v850_v61, 0.0 }
 0x3ff   :  { %v883_v48 = vsel %vm64_vm0, %v875_v46, 0.0  ;;  %v859_v58 = vsel %vm64_vm0, %v851_v57, 0.0  ;;  %v853_v0 = vrot.slane %v852_v63, 4  ;;  %vm825_vm0 = vcmask 23568  }
 0x400   :  { %v1552_v49 = vadd.f32 %v881_v47, %v880_v43  ;;  %v884_v50 = vrot.slane %v883_v48, 4  ;;  %v860_v60 = vrot.slane %v859_v58, 4  ;;  %v826_v21 = vsel %vm825_vm0, %v1540_v35, 0.0 }
 0x401   :  { %v854_v2 = vadd.f32 %v853_v0, %v852_v63  ;;  %v827_v23 = vrot.slane %v826_v21, 4  ;;  %v833_v8 = vsel %vm825_vm0, %v1536_v33, 0.0 }
 0x402   :  { %v885_v51 = vadd.f32 %v884_v50, %v883_v48  ;;  %900 = vrot.lane.b32.xlu2 %v1552_v49, %s1213_s3  ;;  %v861_v62 = vadd.f32 %v860_v60, %v859_v58  ;;  %v834_v27 = vrot.slane %v833_v8, 4 }
 0x403   :  { %v855_v4 = vrot.slane %v854_v2, 2  ;;  %v828_v26 = vadd.f32 %v827_v23, %v826_v21 }
 0x404   :  { %v886_v52 = vrot.slane %v885_v51, 2  ;;  %v862_v1 = vrot.slane %v861_v62, 2  ;;  %v835_v37 = vadd.f32 %v834_v27, %v833_v8 }
 0x405   :  { %v856_v6 = vadd.f32 %v855_v4, %v854_v2  ;;  %v829_v32 = vrot.slane %v828_v26, 2 }
 0x406   :  { %v887_v53 = vadd.f32 %v886_v52, %v885_v51  ;;  %v863_v3 = vadd.f32 %v862_v1, %v861_v62  ;;  %v836_v42 = vrot.slane %v835_v37, 2 }
 0x407   :  { %v857_v13 = vrot.slane %v856_v6, 1  ;;  %v830_v40 = vadd.f32 %v829_v32, %v828_v26 }
 0x408   :  { %v888_v54 = vrot.slane %v887_v53, 1  ;;  %v864_v5 = vrot.slane %v863_v3, 1  ;;  %v837_v48 = vadd.f32 %v836_v42, %v835_v37 }
 0x409   :  { %v858_v15 = vadd.f32 %v857_v13, %v856_v6  ;;  %v831_v45 = vrot.slane %v830_v40, 1 }
 0x40a   :  { %v1556_v55 = vadd.f32 %v888_v54, %v887_v53  ;;  %v1572_v7 = vadd.f32 %v864_v5, %v863_v3  ;;  %v838_v52 = vrot.slane %v837_v48, 1 }
 0x40b   :  { %v832_v51 = vadd.f32 %v831_v45, %v830_v40  ;;  %v964_v2 = vadd.f32 %v1552_v49, %v858_v15 }
 0x40c   :  { %928 = vrot.lane.b32.xlu0 %v1556_v55, %s1231_s27  ;;  %902 = vrot.lane.b32.xlu1 %v1556_v55, %s1213_s3  ;;  %v839_v53 = vadd.f32 %v838_v52, %v837_v48  ;;  %v965_v0 = vadd.f32 %v1556_v55, %v1572_v7  ;;  %s1234_s3 = smov [#allocation8]  }
 0x40d   :  { %920 = vrot.lane.b32.xlu2 %v1556_v55, %s1214_s16 }
 0x414   :  { %894 = vrot.lane.b32.xlu0 %v1556_v55, %s1232_s0  ;;  %926 = vrot.lane.b32.xlu1 %v1552_v49, %s1231_s27 }
 0x415   :  { %918 = vrot.lane.b32.xlu2 %v1552_v49, %s1214_s16 }
 0x41c   :  { %892 = vrot.lane.b32.xlu1 %v1552_v49, %s1232_s0 }
 0x45c   :  { %v901_v14 = vpop.permute.xlu2 %900 }
 0x45d   :  { %v906_v17 = vmul.f32 %v901_v14, %v858_v15 }
 0x467   :  { %v921_v19 = vpop.permute.xlu2 %920 }
 0x468   :  { %v925_v28 = vmul.f32 %v921_v19, %v1572_v7 }
 0x46f   :  { %v919_v22 = vpop.permute.xlu2 %918 }
 0x470   :  { %v924_v34 = vmul.f32 %v919_v22, %v858_v15 }
 0x47e   :  { %v929_v9 = vpop.permute.xlu0 %928  ;;  %v903_v10 = vpop.permute.xlu1 %902 }
 0x47f   :  { %v933_v11 = vmul.f32 %v929_v9, %v1572_v7  ;;  %v907_v12 = vmul.f32 %v903_v10, %v1572_v7 }
 0x481   :  { %912 = vrot.lane.b32.xlu0 %v907_v12, %s1232_s0  ;;  %938 = vrot.lane.b32.xlu1 %v933_v11, %s1214_s16 }
 0x486   :  { %v927_v16 = vpop.permute.xlu1 %926  ;;  %v895_v24 = vpop.permute.xlu0 %894 }
 0x487   :  { %v932_v18 = vmul.f32 %v927_v16, %v858_v15  ;;  %v899_v35 = vmul.f32 %v895_v24, %v1572_v7 }
 0x489   :  { %936 = vrot.lane.b32.xlu2 %v932_v18, %s1214_s16  ;;  %910 = vrot.lane.b32.xlu0 %v906_v17, %s1232_s0 }
 0x48e   :  { %v893_v25 = vpop.permute.xlu1 %892 }
 0x48f   :  { %v898_v43 = vmul.f32 %v893_v25, %v858_v15 }
 0x4e3   :  { %v937_v29 = vpop.permute.xlu2 %936 }
 0x4e4   :  { %v942_v38 = vsub.f32 %v924_v34, %v937_v29 }
 0x4f3   :  { %v913_v30 = vpop.permute.xlu0 %912  ;;  %v939_v31 = vpop.permute.xlu1 %938 }
 0x4f4   :  { %v943_v36 = vsub.f32 %v925_v28, %v939_v31  ;;  %v917_v41 = vsub.f32 %v899_v35, %v913_v30 }
 0x4f6   :  { %v954_v39 = vrot.slane %v943_v36, 7  ;;  %v946_v46 = vrot.slane %v917_v41, 7 }
 0x4f8   :  { %v955_v33 = vsel %vm947_vm7, %v954_v39, %v942_v38 }
 0x4f9   :  { %956 = vrot.lane.b32.xlu0 %v955_v33, %s1232_s0 }
 0x4fb   :  { %v911_v44 = vpop.permute.xlu0 %910 }
 0x4fc   :  { %v916_v47 = vsub.f32 %v898_v43, %v911_v44 }
 0x4fe   :  { %v948_v50 = vsel %vm947_vm7, %v946_v46, %v916_v47 }
 0x4ff   :  { %959 = vrot.lane.b32.xlu2 %v948_v50, %s1214_s16  ;;  %949 = vrot.lane.b32.xlu1 %v948_v50, %s1232_s0  ;;  %s996_s16 = sshll.u32 %s1234_s3, 4  ;;  %s997_s16 = int_to_ptr.vmem [resolvable:$true] %s996_s16 }
 0x501   :  { %968 = vperm.xlu0 %1077, %v832_v51  }
 0x507   :  { %973 = vperm.xlu1 %1076, %v839_v53  }
 0x559   :  { %v960_v58 = vpop.permute.xlu2 %959 }
 0x56b   :  { %v957_v54 = vpop.permute.xlu0 %956 }
 0x571   :  { %v950_v56 = vpop.permute.xlu1 %949 }
 0x572   :  { %v962_v57 = vsel %vm661_vm9, %v950_v56, %v957_v54 }
 0x573   :  { %v963_v59 = vsel %vm664_vm10, %v962_v57, %v960_v58  ;;  %v969_v60 = vpop.permute.xlu0 %968 }
 0x574   :  { %v977_v61 = vrot.slane %v963_v59, 1  ;;  %v980_v63 = vmul.f32 %v969_v60, %v963_v59 }
 0x576   :  { %v982_v4 = vadd.f32 %v980_v63, %v964_v2 }
 0x579   :  { %v974_v62 = vpop.permute.xlu1 %973 }
 0x57a   :  { %v981_v1 = vmul.f32 %v977_v61, %v974_v62 }
 0x57c   :  { %v983_v3 = vadd.f32 %v981_v1, %v965_v0 }
 0x57e   :  { %v986_v5 = vrot.slane %v983_v3, 7 }
 0x580   :  { %v987_v6 = vsel %vm947_vm7, %v986_v5, %v982_v4 }
 0x581   :  { %990 = vst.msk [vmem:[#allocation8] sm:$0x3] %vm989_vm8, %v987_v6 }
 0x582   :  { %1001 = dma.vmem_to_hbm [thread:$0]  %s997_s16, 32, %s999_s30, [#allocation4]  }
 0x583   :  { %1208 = dma.done.wait [#allocation4], 32  }
 0x584   :  { %1209 = vsyncadd [#allocation4], 4294967264 }
 0x585   :  { %1006 = vsyncpa [#allocation4], 1 }
 0x586   :  { %1007 = vsyncpa [#allocation5], 1 }
 0x587   :  { %1008 = vsyncpa [#allocation7], 1 }

</bundles_post_ra>
